<compile_context>
chip_gen: v6e
topology: v6e:2x2x1
jax: 0.10.0
libtpu: 0.0.40
codegen_flags: <defaults>
</compile_context>

<pallas_src>
import functools

import jax
import jax.numpy as jnp
import numpy as np
from jax.experimental import pallas as pl
from jax.experimental.pallas import tpu as pltpu

_CSQ = 3  # squeeze / tower channel count
# Non-center taps of the 3x3 kernel, in the order the pad-mask slab is built.
_TAPS = tuple((ky, kx) for ky in range(3) for kx in range(3) if (ky, kx) != (1, 1))


def _build_pad_masks(H, W):
    """(8, H*W) f32 0/1 masks: tap (dy,dx) is valid iff (h+dy, w+dx) in-bounds.

    Emulates the zero padding of the 3x3 conv and also zeroes the circular-wrap
    positions introduced by pltpu.roll on the flattened spatial axis.
    """
    f = np.arange(H * W)
    h, w = f // W, f % W
    masks = []
    for ky, kx in _TAPS:
        dy, dx = ky - 1, kx - 1
        ok = (h + dy >= 0) & (h + dy < H) & (w + dx >= 0) & (w + dx < W)
        masks.append(ok.astype(np.float32))
    return np.stack(masks, axis=0)


def fireblock_kernel(x_ref, m_ref, wsq_ref, bsq_ref, w1_ref, b1_ref,
                     w2_ref, b2_ref, out_ref, *, H, W, Cin):
    # x_ref:   (1, BN, Cin*HW) VMEM block  (lane-dense channel slices)
    # m_ref:   (8, HW)         VMEM, f32 0/1 pad masks (constant across grid)
    # out_ref: (1, BN, 6*HW)   VMEM block; lanes [0,3HW)=tower_one, [3HW,6HW)=tower_two
    # weight/bias refs: flattened f32 arrays in SMEM (scalar reads).
    HW = H * W

    # ---- hoist all SMEM scalars into locals (read once) ----
    wsq = [[wsq_ref[d * Cin + c] for c in range(Cin)] for d in range(_CSQ)]
    bsq = [bsq_ref[d] for d in range(_CSQ)]
    w1 = [[w1_ref[d * _CSQ + c] for c in range(_CSQ)] for d in range(_CSQ)]
    b1 = [b1_ref[d] for d in range(_CSQ)]
    w2 = [[[[w2_ref[((d * _CSQ + c) * 3 + ky) * 3 + kx] for kx in range(3)]
            for ky in range(3)] for c in range(_CSQ)] for d in range(_CSQ)]
    b2 = [b2_ref[d] for d in range(_CSQ)]

    # ---- squeeze: 1x1 conv (Cin -> 3) + ReLU, streamed input channels ----
    sq = [None] * _CSQ
    for c in range(Cin):
        xc = x_ref[0, :, c * HW:(c + 1) * HW]        # (BN, HW) dense lane slice
        for d in range(_CSQ):
            t = xc * wsq[d][c]
            sq[d] = t if sq[d] is None else sq[d] + t
    sq = [jnp.maximum(sq[d] + bsq[d], 0.0) for d in range(_CSQ)]

    # ---- tower_one: 1x1 conv (3 -> 3) + ReLU -> lanes [0, 3*HW) ----
    for d in range(_CSQ):
        acc = sq[0] * w1[d][0] + sq[1] * w1[d][1] + sq[2] * w1[d][2]
        out_ref[0, :, d * HW:(d + 1) * HW] = jnp.maximum(acc + b1[d], 0.0)

    # ---- tower_two: 3x3 conv (3 -> 3), padding=1, + ReLU -> lanes [3*HW, 6*HW) ----
    acc2 = [None] * _CSQ
    # Center tap: no roll, no mask.
    for c in range(_CSQ):
        for d in range(_CSQ):
            t = sq[c] * w2[d][c][1][1]
            acc2[d] = t if acc2[d] is None else acc2[d] + t
    # 8 shifted taps: XLU roll over the flattened spatial axis + precomputed
    # 0/1 pad mask (sublane-broadcast from (1, HW)).
    for tap, (ky, kx) in enumerate(_TAPS):
        dy, dx = ky - 1, kx - 1
        s = dy * W + dx                               # source offset along HW
        m = m_ref[tap:tap + 1, :]                     # (1, HW)
        for c in range(_CSQ):
            v = pltpu.roll(sq[c], shift=(-s) % HW, axis=1) * m
            for d in range(_CSQ):
                acc2[d] = acc2[d] + v * w2[d][c][ky][kx]
    for d in range(_CSQ):
        out_ref[0, :, (d + _CSQ) * HW:(d + _CSQ + 1) * HW] = \
            jnp.maximum(acc2[d] + b2[d], 0.0)


def naive_fireblock(x, wsq, bsq, w1, b1, w2, b2):
    N, Cin, H, W = x.shape
    HW = H * W
    Cout = 2 * _CSQ

    # ---- block / grid selection ------------------------------------------
    per_img_bytes = 4 * (Cin + Cout) * HW
    # ~2 MiB of in+out payload per grid step.
    block_n = max(1, (2 << 20) // per_img_bytes)
    if N >= 2:
        # Keep >= 2 grid steps so the "parallel" batch axis can feed both
        # TensorCores of a v7x megacore (no-op on v5e/v6e).
        block_n = min(block_n, pl.cdiv(N, 2))
    else:
        block_n = 1
    if block_n >= 8:
        block_n = (block_n // 8) * 8                  # full sublanes per block
    n_steps = pl.cdiv(N, block_n)
    N_pad = n_steps * block_n

    # ---- lane-dense layout: channels folded into the lane axis ------------
    x_flat = x.reshape(N, Cin * HW)                   # free (row-major) reshape
    if N_pad != N:
        x_flat = jnp.pad(x_flat, ((0, N_pad - N), (0, 0)))
    x_blocks = x_flat.reshape(n_steps, block_n, Cin * HW)

    masks = jnp.asarray(_build_pad_masks(H, W))       # (8, HW) f32 0/1

    smem = pl.BlockSpec(memory_space=pltpu.MemorySpace.SMEM)
    x_spec = pl.BlockSpec((1, block_n, Cin * HW), lambda i: (i, 0, 0))
    m_spec = pl.BlockSpec((8, HW), lambda i: (0, 0))  # constant: DMA'd once
    out_spec = pl.BlockSpec((1, block_n, Cout * HW), lambda i: (i, 0, 0))

    kernel = functools.partial(fireblock_kernel, H=H, W=W, Cin=Cin)

    # Advisory cost for XLA scheduling.
    flops = 2 * (Cin * _CSQ + _CSQ * _CSQ + 9 * _CSQ * _CSQ) * N_pad * HW
    param_bytes = 4 * (wsq.size + bsq.size + w1.size + b1.size + w2.size + b2.size)
    bytes_accessed = 4 * (Cin + Cout) * N_pad * HW + param_bytes + 4 * masks.size

    # Generation-aware scoped-VMEM budget: double-buffered in+out blocks plus
    # ~16 block_n*HW temporaries (sq, acc2, rolled/masked slabs) + headroom,
    # capped at 75% of physical VMEM (48 MiB on v7x, 96 MiB on v5e/v6e).
    slab = 4 * block_n * HW
    vmem_need = 2 * (Cin + Cout) * slab + 16 * slab + 2 * 4 * masks.size + (2 << 20)
    try:
        vmem_cap = int(pltpu.get_tpu_info().vmem_capacity_bytes)
    except Exception:
        vmem_cap = 64 * 1024 * 1024
    vmem_limit = int(min((vmem_cap * 3) // 4, max(16 << 20, vmem_need)))

    out = pl.pallas_call(
        kernel,
        out_shape=jax.ShapeDtypeStruct((n_steps, block_n, Cout * HW), jnp.float32),
        grid_spec=pltpu.PrefetchScalarGridSpec(
            num_scalar_prefetch=0,
            grid=(n_steps,),
            in_specs=[x_spec, m_spec, smem, smem, smem, smem, smem, smem],
            out_specs=out_spec,
        ),
        compiler_params=pltpu.CompilerParams(
            dimension_semantics=("parallel",),
            vmem_limit_bytes=vmem_limit,
        ),
        cost_estimate=pl.CostEstimate(
            flops=flops, transcendentals=0, bytes_accessed=bytes_accessed),
    )(x_blocks, masks,
      wsq.reshape(-1), bsq.reshape(-1),
      w1.reshape(-1), b1.reshape(-1),
      w2.reshape(-1), b2.reshape(-1))

    out = out.reshape(N_pad, Cout * HW)[:N]
    return out.reshape(N, Cout, H, W)


def reference_forward(x, wsq, bsq, w1, b1, w2, b2):
    dn = ("NCHW", "OIHW", "NCHW")
    sq = jax.lax.conv_general_dilated(x, wsq, (1, 1), "VALID", dimension_numbers=dn)
    sq = jnp.maximum(sq + bsq[None, :, None, None], 0.0)
    t1 = jax.lax.conv_general_dilated(sq, w1, (1, 1), "VALID", dimension_numbers=dn)
    t1 = jnp.maximum(t1 + b1[None, :, None, None], 0.0)
    t2 = jax.lax.conv_general_dilated(sq, w2, (1, 1), "SAME", dimension_numbers=dn)
    t2 = jnp.maximum(t2 + b2[None, :, None, None], 0.0)
    return jnp.concatenate([t1, t2], axis=1)


if __name__ == "__main__":
    N, Cin, H, W = 2, 4, 16, 16

    key = jax.random.PRNGKey(0)
    kx, k1, k2, k3, k4, k5, k6 = jax.random.split(key, 7)

    x = jax.random.normal(kx, (N, Cin, H, W), jnp.float32)

    # Deterministic synthetic parameters (torch.nn.Conv2d layout: OIHW + bias).
    wsq = jax.random.normal(k1, (3, Cin, 1, 1), jnp.float32) * 0.5
    bsq = jax.random.normal(k2, (3,), jnp.float32) * 0.1
    w1 = jax.random.normal(k3, (3, 3, 1, 1), jnp.float32) * 0.5
    b1 = jax.random.normal(k4, (3,), jnp.float32) * 0.1
    w2 = jax.random.normal(k5, (3, 3, 3, 3), jnp.float32) * 0.3
    b2 = jax.random.normal(k6, (3,), jnp.float32) * 0.1

    out = naive_fireblock(x, wsq, bsq, w1, b1, w2, b2)
    out = jax.block_until_ready(out)

    ref = reference_forward(x, wsq, bsq, w1, b1, w2, b2)
    np.testing.assert_allclose(np.asarray(out), np.asarray(ref), atol=1e-4, rtol=1e-4)
    assert out.shape == (N, 6, H, W)

    print("KERNEL_OK")
</pallas_src>

<mosaic_0001>
module attributes {stable_mosaic.version = 11 : i64} {
  func.func @fireblock_kernel(%arg0: i32, %arg1: memref<1x1x1024xf32, #tpu.memory_space<vmem>>, %arg2: memref<8x256xf32, #tpu.memory_space<vmem>>, %arg3: memref<12xf32, #tpu.memory_space<smem>>, %arg4: memref<3xf32, #tpu.memory_space<smem>>, %arg5: memref<9xf32, #tpu.memory_space<smem>>, %arg6: memref<3xf32, #tpu.memory_space<smem>>, %arg7: memref<81xf32, #tpu.memory_space<smem>>, %arg8: memref<3xf32, #tpu.memory_space<smem>>, %arg9: memref<1x1x1536xf32, #tpu.memory_space<vmem>>) attributes {dimension_semantics = [#tpu.dimension_semantics<parallel>], iteration_bounds = array<i64: 2>, scalar_prefetch = 0 : i64, scratch_operands = 0 : i64, tpu.core_type = #tpu.core_type<tc>, window_params = [{transform_indices = @transform_0, window_bounds = array<i64: 1, 1, 1024>}, {pipeline_mode = #tpu.pipeline_mode<synchronous>, transform_indices = @transform_1, window_bounds = array<i64: 8, 256>}, {transform_indices = @transform_2, window_bounds = array<i64: 12>}, {transform_indices = @transform_3, window_bounds = array<i64: 3>}, {transform_indices = @transform_4, window_bounds = array<i64: 9>}, {transform_indices = @transform_5, window_bounds = array<i64: 3>}, {transform_indices = @transform_6, window_bounds = array<i64: 81>}, {transform_indices = @transform_7, window_bounds = array<i64: 3>}, {transform_indices = @transform_8, window_bounds = array<i64: 1, 1, 1536>}]} {
    %c0 = arith.constant 0 : index
    %0 = memref.load %arg3[%c0] : memref<12xf32, #tpu.memory_space<smem>>
    %c1 = arith.constant 1 : index
    %1 = memref.load %arg3[%c1] : memref<12xf32, #tpu.memory_space<smem>>
    %c2 = arith.constant 2 : index
    %2 = memref.load %arg3[%c2] : memref<12xf32, #tpu.memory_space<smem>>
    %c3 = arith.constant 3 : index
    %3 = memref.load %arg3[%c3] : memref<12xf32, #tpu.memory_space<smem>>
    %c4 = arith.constant 4 : index
    %4 = memref.load %arg3[%c4] : memref<12xf32, #tpu.memory_space<smem>>
    %c5 = arith.constant 5 : index
    %5 = memref.load %arg3[%c5] : memref<12xf32, #tpu.memory_space<smem>>
    %c6 = arith.constant 6 : index
    %6 = memref.load %arg3[%c6] : memref<12xf32, #tpu.memory_space<smem>>
    %c7 = arith.constant 7 : index
    %7 = memref.load %arg3[%c7] : memref<12xf32, #tpu.memory_space<smem>>
    %c8 = arith.constant 8 : index
    %8 = memref.load %arg3[%c8] : memref<12xf32, #tpu.memory_space<smem>>
    %c9 = arith.constant 9 : index
    %9 = memref.load %arg3[%c9] : memref<12xf32, #tpu.memory_space<smem>>
    %c10 = arith.constant 10 : index
    %10 = memref.load %arg3[%c10] : memref<12xf32, #tpu.memory_space<smem>>
    %c11 = arith.constant 11 : index
    %11 = memref.load %arg3[%c11] : memref<12xf32, #tpu.memory_space<smem>>
    %c0_0 = arith.constant 0 : index
    %12 = memref.load %arg4[%c0_0] : memref<3xf32, #tpu.memory_space<smem>>
    %c1_1 = arith.constant 1 : index
    %13 = memref.load %arg4[%c1_1] : memref<3xf32, #tpu.memory_space<smem>>
    %c2_2 = arith.constant 2 : index
    %14 = memref.load %arg4[%c2_2] : memref<3xf32, #tpu.memory_space<smem>>
    %c0_3 = arith.constant 0 : index
    %15 = memref.load %arg5[%c0_3] : memref<9xf32, #tpu.memory_space<smem>>
    %c1_4 = arith.constant 1 : index
    %16 = memref.load %arg5[%c1_4] : memref<9xf32, #tpu.memory_space<smem>>
    %c2_5 = arith.constant 2 : index
    %17 = memref.load %arg5[%c2_5] : memref<9xf32, #tpu.memory_space<smem>>
    %c3_6 = arith.constant 3 : index
    %18 = memref.load %arg5[%c3_6] : memref<9xf32, #tpu.memory_space<smem>>
    %c4_7 = arith.constant 4 : index
    %19 = memref.load %arg5[%c4_7] : memref<9xf32, #tpu.memory_space<smem>>
    %c5_8 = arith.constant 5 : index
    %20 = memref.load %arg5[%c5_8] : memref<9xf32, #tpu.memory_space<smem>>
    %c6_9 = arith.constant 6 : index
    %21 = memref.load %arg5[%c6_9] : memref<9xf32, #tpu.memory_space<smem>>
    %c7_10 = arith.constant 7 : index
    %22 = memref.load %arg5[%c7_10] : memref<9xf32, #tpu.memory_space<smem>>
    %c8_11 = arith.constant 8 : index
    %23 = memref.load %arg5[%c8_11] : memref<9xf32, #tpu.memory_space<smem>>
    %c0_12 = arith.constant 0 : index
    %24 = memref.load %arg6[%c0_12] : memref<3xf32, #tpu.memory_space<smem>>
    %c1_13 = arith.constant 1 : index
    %25 = memref.load %arg6[%c1_13] : memref<3xf32, #tpu.memory_space<smem>>
    %c2_14 = arith.constant 2 : index
    %26 = memref.load %arg6[%c2_14] : memref<3xf32, #tpu.memory_space<smem>>
    %c0_15 = arith.constant 0 : index
    %27 = memref.load %arg7[%c0_15] : memref<81xf32, #tpu.memory_space<smem>>
    %c1_16 = arith.constant 1 : index
    %28 = memref.load %arg7[%c1_16] : memref<81xf32, #tpu.memory_space<smem>>
    %c2_17 = arith.constant 2 : index
    %29 = memref.load %arg7[%c2_17] : memref<81xf32, #tpu.memory_space<smem>>
    %c3_18 = arith.constant 3 : index
    %30 = memref.load %arg7[%c3_18] : memref<81xf32, #tpu.memory_space<smem>>
    %c4_19 = arith.constant 4 : index
    %31 = memref.load %arg7[%c4_19] : memref<81xf32, #tpu.memory_space<smem>>
    %c5_20 = arith.constant 5 : index
    %32 = memref.load %arg7[%c5_20] : memref<81xf32, #tpu.memory_space<smem>>
    %c6_21 = arith.constant 6 : index
    %33 = memref.load %arg7[%c6_21] : memref<81xf32, #tpu.memory_space<smem>>
    %c7_22 = arith.constant 7 : index
    %34 = memref.load %arg7[%c7_22] : memref<81xf32, #tpu.memory_space<smem>>
    %c8_23 = arith.constant 8 : index
    %35 = memref.load %arg7[%c8_23] : memref<81xf32, #tpu.memory_space<smem>>
    %c9_24 = arith.constant 9 : index
    %36 = memref.load %arg7[%c9_24] : memref<81xf32, #tpu.memory_space<smem>>
    %c10_25 = arith.constant 10 : index
    %37 = memref.load %arg7[%c10_25] : memref<81xf32, #tpu.memory_space<smem>>
    %c11_26 = arith.constant 11 : index
    %38 = memref.load %arg7[%c11_26] : memref<81xf32, #tpu.memory_space<smem>>
    %c12 = arith.constant 12 : index
    %39 = memref.load %arg7[%c12] : memref<81xf32, #tpu.memory_space<smem>>
    %c13 = arith.constant 13 : index
    %40 = memref.load %arg7[%c13] : memref<81xf32, #tpu.memory_space<smem>>
    %c14 = arith.constant 14 : index
    %41 = memref.load %arg7[%c14] : memref<81xf32, #tpu.memory_space<smem>>
    %c15 = arith.constant 15 : index
    %42 = memref.load %arg7[%c15] : memref<81xf32, #tpu.memory_space<smem>>
    %c16 = arith.constant 16 : index
    %43 = memref.load %arg7[%c16] : memref<81xf32, #tpu.memory_space<smem>>
    %c17 = arith.constant 17 : index
    %44 = memref.load %arg7[%c17] : memref<81xf32, #tpu.memory_space<smem>>
    %c18 = arith.constant 18 : index
    %45 = memref.load %arg7[%c18] : memref<81xf32, #tpu.memory_space<smem>>
    %c19 = arith.constant 19 : index
    %46 = memref.load %arg7[%c19] : memref<81xf32, #tpu.memory_space<smem>>
    %c20 = arith.constant 20 : index
    %47 = memref.load %arg7[%c20] : memref<81xf32, #tpu.memory_space<smem>>
    %c21 = arith.constant 21 : index
    %48 = memref.load %arg7[%c21] : memref<81xf32, #tpu.memory_space<smem>>
    %c22 = arith.constant 22 : index
    %49 = memref.load %arg7[%c22] : memref<81xf32, #tpu.memory_space<smem>>
    %c23 = arith.constant 23 : index
    %50 = memref.load %arg7[%c23] : memref<81xf32, #tpu.memory_space<smem>>
    %c24 = arith.constant 24 : index
    %51 = memref.load %arg7[%c24] : memref<81xf32, #tpu.memory_space<smem>>
    %c25 = arith.constant 25 : index
    %52 = memref.load %arg7[%c25] : memref<81xf32, #tpu.memory_space<smem>>
    %c26 = arith.constant 26 : index
    %53 = memref.load %arg7[%c26] : memref<81xf32, #tpu.memory_space<smem>>
    %c27 = arith.constant 27 : index
    %54 = memref.load %arg7[%c27] : memref<81xf32, #tpu.memory_space<smem>>
    %c28 = arith.constant 28 : index
    %55 = memref.load %arg7[%c28] : memref<81xf32, #tpu.memory_space<smem>>
    %c29 = arith.constant 29 : index
    %56 = memref.load %arg7[%c29] : memref<81xf32, #tpu.memory_space<smem>>
    %c30 = arith.constant 30 : index
    %57 = memref.load %arg7[%c30] : memref<81xf32, #tpu.memory_space<smem>>
    %c31 = arith.constant 31 : index
    %58 = memref.load %arg7[%c31] : memref<81xf32, #tpu.memory_space<smem>>
    %c32 = arith.constant 32 : index
    %59 = memref.load %arg7[%c32] : memref<81xf32, #tpu.memory_space<smem>>
    %c33 = arith.constant 33 : index
    %60 = memref.load %arg7[%c33] : memref<81xf32, #tpu.memory_space<smem>>
    %c34 = arith.constant 34 : index
    %61 = memref.load %arg7[%c34] : memref<81xf32, #tpu.memory_space<smem>>
    %c35 = arith.constant 35 : index
    %62 = memref.load %arg7[%c35] : memref<81xf32, #tpu.memory_space<smem>>
    %c36 = arith.constant 36 : index
    %63 = memref.load %arg7[%c36] : memref<81xf32, #tpu.memory_space<smem>>
    %c37 = arith.constant 37 : index
    %64 = memref.load %arg7[%c37] : memref<81xf32, #tpu.memory_space<smem>>
    %c38 = arith.constant 38 : index
    %65 = memref.load %arg7[%c38] : memref<81xf32, #tpu.memory_space<smem>>
    %c39 = arith.constant 39 : index
    %66 = memref.load %arg7[%c39] : memref<81xf32, #tpu.memory_space<smem>>
    %c40 = arith.constant 40 : index
    %67 = memref.load %arg7[%c40] : memref<81xf32, #tpu.memory_space<smem>>
    %c41 = arith.constant 41 : index
    %68 = memref.load %arg7[%c41] : memref<81xf32, #tpu.memory_space<smem>>
    %c42 = arith.constant 42 : index
    %69 = memref.load %arg7[%c42] : memref<81xf32, #tpu.memory_space<smem>>
    %c43 = arith.constant 43 : index
    %70 = memref.load %arg7[%c43] : memref<81xf32, #tpu.memory_space<smem>>
    %c44 = arith.constant 44 : index
    %71 = memref.load %arg7[%c44] : memref<81xf32, #tpu.memory_space<smem>>
    %c45 = arith.constant 45 : index
    %72 = memref.load %arg7[%c45] : memref<81xf32, #tpu.memory_space<smem>>
    %c46 = arith.constant 46 : index
    %73 = memref.load %arg7[%c46] : memref<81xf32, #tpu.memory_space<smem>>
    %c47 = arith.constant 47 : index
    %74 = memref.load %arg7[%c47] : memref<81xf32, #tpu.memory_space<smem>>
    %c48 = arith.constant 48 : index
    %75 = memref.load %arg7[%c48] : memref<81xf32, #tpu.memory_space<smem>>
    %c49 = arith.constant 49 : index
    %76 = memref.load %arg7[%c49] : memref<81xf32, #tpu.memory_space<smem>>
    %c50 = arith.constant 50 : index
    %77 = memref.load %arg7[%c50] : memref<81xf32, #tpu.memory_space<smem>>
    %c51 = arith.constant 51 : index
    %78 = memref.load %arg7[%c51] : memref<81xf32, #tpu.memory_space<smem>>
    %c52 = arith.constant 52 : index
    %79 = memref.load %arg7[%c52] : memref<81xf32, #tpu.memory_space<smem>>
    %c53 = arith.constant 53 : index
    %80 = memref.load %arg7[%c53] : memref<81xf32, #tpu.memory_space<smem>>
    %c54 = arith.constant 54 : index
    %81 = memref.load %arg7[%c54] : memref<81xf32, #tpu.memory_space<smem>>
    %c55 = arith.constant 55 : index
    %82 = memref.load %arg7[%c55] : memref<81xf32, #tpu.memory_space<smem>>
    %c56 = arith.constant 56 : index
    %83 = memref.load %arg7[%c56] : memref<81xf32, #tpu.memory_space<smem>>
    %c57 = arith.constant 57 : index
    %84 = memref.load %arg7[%c57] : memref<81xf32, #tpu.memory_space<smem>>
    %c58 = arith.constant 58 : index
    %85 = memref.load %arg7[%c58] : memref<81xf32, #tpu.memory_space<smem>>
    %c59 = arith.constant 59 : index
    %86 = memref.load %arg7[%c59] : memref<81xf32, #tpu.memory_space<smem>>
    %c60 = arith.constant 60 : index
    %87 = memref.load %arg7[%c60] : memref<81xf32, #tpu.memory_space<smem>>
    %c61 = arith.constant 61 : index
    %88 = memref.load %arg7[%c61] : memref<81xf32, #tpu.memory_space<smem>>
    %c62 = arith.constant 62 : index
    %89 = memref.load %arg7[%c62] : memref<81xf32, #tpu.memory_space<smem>>
    %c63 = arith.constant 63 : index
    %90 = memref.load %arg7[%c63] : memref<81xf32, #tpu.memory_space<smem>>
    %c64 = arith.constant 64 : index
    %91 = memref.load %arg7[%c64] : memref<81xf32, #tpu.memory_space<smem>>
    %c65 = arith.constant 65 : index
    %92 = memref.load %arg7[%c65] : memref<81xf32, #tpu.memory_space<smem>>
    %c66 = arith.constant 66 : index
    %93 = memref.load %arg7[%c66] : memref<81xf32, #tpu.memory_space<smem>>
    %c67 = arith.constant 67 : index
    %94 = memref.load %arg7[%c67] : memref<81xf32, #tpu.memory_space<smem>>
    %c68 = arith.constant 68 : index
    %95 = memref.load %arg7[%c68] : memref<81xf32, #tpu.memory_space<smem>>
    %c69 = arith.constant 69 : index
    %96 = memref.load %arg7[%c69] : memref<81xf32, #tpu.memory_space<smem>>
    %c70 = arith.constant 70 : index
    %97 = memref.load %arg7[%c70] : memref<81xf32, #tpu.memory_space<smem>>
    %c71 = arith.constant 71 : index
    %98 = memref.load %arg7[%c71] : memref<81xf32, #tpu.memory_space<smem>>
    %c72 = arith.constant 72 : index
    %99 = memref.load %arg7[%c72] : memref<81xf32, #tpu.memory_space<smem>>
    %c73 = arith.constant 73 : index
    %100 = memref.load %arg7[%c73] : memref<81xf32, #tpu.memory_space<smem>>
    %c74 = arith.constant 74 : index
    %101 = memref.load %arg7[%c74] : memref<81xf32, #tpu.memory_space<smem>>
    %c75 = arith.constant 75 : index
    %102 = memref.load %arg7[%c75] : memref<81xf32, #tpu.memory_space<smem>>
    %c76 = arith.constant 76 : index
    %103 = memref.load %arg7[%c76] : memref<81xf32, #tpu.memory_space<smem>>
    %c77 = arith.constant 77 : index
    %104 = memref.load %arg7[%c77] : memref<81xf32, #tpu.memory_space<smem>>
    %c78 = arith.constant 78 : index
    %105 = memref.load %arg7[%c78] : memref<81xf32, #tpu.memory_space<smem>>
    %c79 = arith.constant 79 : index
    %106 = memref.load %arg7[%c79] : memref<81xf32, #tpu.memory_space<smem>>
    %c80 = arith.constant 80 : index
    %107 = memref.load %arg7[%c80] : memref<81xf32, #tpu.memory_space<smem>>
    %c0_27 = arith.constant 0 : index
    %108 = memref.load %arg8[%c0_27] : memref<3xf32, #tpu.memory_space<smem>>
    %c1_28 = arith.constant 1 : index
    %109 = memref.load %arg8[%c1_28] : memref<3xf32, #tpu.memory_space<smem>>
    %c2_29 = arith.constant 2 : index
    %110 = memref.load %arg8[%c2_29] : memref<3xf32, #tpu.memory_space<smem>>
    %c0_30 = arith.constant 0 : index
    %c0_31 = arith.constant 0 : index
    %c0_32 = arith.constant 0 : index
    %111 = vector.load %arg1[%c0_30, %c0_31, %c0_32] : memref<1x1x1024xf32, #tpu.memory_space<vmem>>, vector<1x1x256xf32>
    %112 = vector.shape_cast %111 : vector<1x1x256xf32> to vector<1x256xf32>
    %113 = vector.broadcast %0 : f32 to vector<1x256xf32>
    %114 = arith.mulf %112, %113 : vector<1x256xf32>
    %115 = vector.broadcast %4 : f32 to vector<1x256xf32>
    %116 = arith.mulf %112, %115 : vector<1x256xf32>
    %117 = vector.broadcast %8 : f32 to vector<1x256xf32>
    %118 = arith.mulf %112, %117 : vector<1x256xf32>
    %c0_33 = arith.constant 0 : index
    %c0_34 = arith.constant 0 : index
    %c256 = arith.constant 256 : index
    %119 = vector.load %arg1[%c0_33, %c0_34, %c256] : memref<1x1x1024xf32, #tpu.memory_space<vmem>>, vector<1x1x256xf32>
    %120 = vector.shape_cast %119 : vector<1x1x256xf32> to vector<1x256xf32>
    %121 = vector.broadcast %1 : f32 to vector<1x256xf32>
    %122 = arith.mulf %120, %121 : vector<1x256xf32>
    %123 = arith.addf %114, %122 : vector<1x256xf32>
    %124 = vector.broadcast %5 : f32 to vector<1x256xf32>
    %125 = arith.mulf %120, %124 : vector<1x256xf32>
    %126 = arith.addf %116, %125 : vector<1x256xf32>
    %127 = vector.broadcast %9 : f32 to vector<1x256xf32>
    %128 = arith.mulf %120, %127 : vector<1x256xf32>
    %129 = arith.addf %118, %128 : vector<1x256xf32>
    %c0_35 = arith.constant 0 : index
    %c0_36 = arith.constant 0 : index
    %c512 = arith.constant 512 : index
    %130 = vector.load %arg1[%c0_35, %c0_36, %c512] : memref<1x1x1024xf32, #tpu.memory_space<vmem>>, vector<1x1x256xf32>
    %131 = vector.shape_cast %130 : vector<1x1x256xf32> to vector<1x256xf32>
    %132 = vector.broadcast %2 : f32 to vector<1x256xf32>
    %133 = arith.mulf %131, %132 : vector<1x256xf32>
    %134 = arith.addf %123, %133 : vector<1x256xf32>
    %135 = vector.broadcast %6 : f32 to vector<1x256xf32>
    %136 = arith.mulf %131, %135 : vector<1x256xf32>
    %137 = arith.addf %126, %136 : vector<1x256xf32>
    %138 = vector.broadcast %10 : f32 to vector<1x256xf32>
    %139 = arith.mulf %131, %138 : vector<1x256xf32>
    %140 = arith.addf %129, %139 : vector<1x256xf32>
    %c0_37 = arith.constant 0 : index
    %c0_38 = arith.constant 0 : index
    %c768 = arith.constant 768 : index
    %141 = vector.load %arg1[%c0_37, %c0_38, %c768] : memref<1x1x1024xf32, #tpu.memory_space<vmem>>, vector<1x1x256xf32>
    %142 = vector.shape_cast %141 : vector<1x1x256xf32> to vector<1x256xf32>
    %143 = vector.broadcast %3 : f32 to vector<1x256xf32>
    %144 = arith.mulf %142, %143 : vector<1x256xf32>
    %145 = arith.addf %134, %144 : vector<1x256xf32>
    %146 = vector.broadcast %7 : f32 to vector<1x256xf32>
    %147 = arith.mulf %142, %146 : vector<1x256xf32>
    %148 = arith.addf %137, %147 : vector<1x256xf32>
    %149 = vector.broadcast %11 : f32 to vector<1x256xf32>
    %150 = arith.mulf %142, %149 : vector<1x256xf32>
    %151 = arith.addf %140, %150 : vector<1x256xf32>
    %152 = vector.broadcast %12 : f32 to vector<1x256xf32>
    %153 = arith.addf %145, %152 : vector<1x256xf32>
    %cst = arith.constant 0.000000e+00 : f32
    %154 = vector.broadcast %cst : f32 to vector<1x256xf32>
    %155 = arith.maximumf %153, %154 : vector<1x256xf32>
    %156 = vector.broadcast %13 : f32 to vector<1x256xf32>
    %157 = arith.addf %148, %156 : vector<1x256xf32>
    %cst_39 = arith.constant 0.000000e+00 : f32
    %158 = vector.broadcast %cst_39 : f32 to vector<1x256xf32>
    %159 = arith.maximumf %157, %158 : vector<1x256xf32>
    %160 = vector.broadcast %14 : f32 to vector<1x256xf32>
    %161 = arith.addf %151, %160 : vector<1x256xf32>
    %cst_40 = arith.constant 0.000000e+00 : f32
    %162 = vector.broadcast %cst_40 : f32 to vector<1x256xf32>
    %163 = arith.maximumf %161, %162 : vector<1x256xf32>
    %164 = vector.broadcast %15 : f32 to vector<1x256xf32>
    %165 = arith.mulf %155, %164 : vector<1x256xf32>
    %166 = vector.broadcast %16 : f32 to vector<1x256xf32>
    %167 = arith.mulf %159, %166 : vector<1x256xf32>
    %168 = arith.addf %165, %167 : vector<1x256xf32>
    %169 = vector.broadcast %17 : f32 to vector<1x256xf32>
    %170 = arith.mulf %163, %169 : vector<1x256xf32>
    %171 = arith.addf %168, %170 : vector<1x256xf32>
    %172 = vector.broadcast %24 : f32 to vector<1x256xf32>
    %173 = arith.addf %171, %172 : vector<1x256xf32>
    %cst_41 = arith.constant 0.000000e+00 : f32
    %174 = vector.broadcast %cst_41 : f32 to vector<1x256xf32>
    %175 = arith.maximumf %173, %174 : vector<1x256xf32>
    %c0_42 = arith.constant 0 : index
    %c0_43 = arith.constant 0 : index
    %c0_44 = arith.constant 0 : index
    %176 = vector.load %arg9[%c0_42, %c0_43, %c0_44] : memref<1x1x1536xf32, #tpu.memory_space<vmem>>, vector<1x1x256xf32>
    %177 = vector.shape_cast %176 : vector<1x1x256xf32> to vector<1x256xf32>
    %178 = vector.shape_cast %175 : vector<1x256xf32> to vector<1x1x256xf32>
    tpu.vector_store %arg9[%c0_42, %c0_43, %c0_44], %178 {strides = array<i32>} : memref<1x1x1536xf32, #tpu.memory_space<vmem>>, vector<1x1x256xf32>,
    %179 = vector.broadcast %18 : f32 to vector<1x256xf32>
    %180 = arith.mulf %155, %179 : vector<1x256xf32>
    %181 = vector.broadcast %19 : f32 to vector<1x256xf32>
    %182 = arith.mulf %159, %181 : vector<1x256xf32>
    %183 = arith.addf %180, %182 : vector<1x256xf32>
    %184 = vector.broadcast %20 : f32 to vector<1x256xf32>
    %185 = arith.mulf %163, %184 : vector<1x256xf32>
    %186 = arith.addf %183, %185 : vector<1x256xf32>
    %187 = vector.broadcast %25 : f32 to vector<1x256xf32>
    %188 = arith.addf %186, %187 : vector<1x256xf32>
    %cst_45 = arith.constant 0.000000e+00 : f32
    %189 = vector.broadcast %cst_45 : f32 to vector<1x256xf32>
    %190 = arith.maximumf %188, %189 : vector<1x256xf32>
    %c0_46 = arith.constant 0 : index
    %c0_47 = arith.constant 0 : index
    %c256_48 = arith.constant 256 : index
    %191 = vector.load %arg9[%c0_46, %c0_47, %c256_48] : memref<1x1x1536xf32, #tpu.memory_space<vmem>>, vector<1x1x256xf32>
    %192 = vector.shape_cast %191 : vector<1x1x256xf32> to vector<1x256xf32>
    %193 = vector.shape_cast %190 : vector<1x256xf32> to vector<1x1x256xf32>
    tpu.vector_store %arg9[%c0_46, %c0_47, %c256_48], %193 {strides = array<i32>} : memref<1x1x1536xf32, #tpu.memory_space<vmem>>, vector<1x1x256xf32>,
    %194 = vector.broadcast %21 : f32 to vector<1x256xf32>
    %195 = arith.mulf %155, %194 : vector<1x256xf32>
    %196 = vector.broadcast %22 : f32 to vector<1x256xf32>
    %197 = arith.mulf %159, %196 : vector<1x256xf32>
    %198 = arith.addf %195, %197 : vector<1x256xf32>
    %199 = vector.broadcast %23 : f32 to vector<1x256xf32>
    %200 = arith.mulf %163, %199 : vector<1x256xf32>
    %201 = arith.addf %198, %200 : vector<1x256xf32>
    %202 = vector.broadcast %26 : f32 to vector<1x256xf32>
    %203 = arith.addf %201, %202 : vector<1x256xf32>
    %cst_49 = arith.constant 0.000000e+00 : f32
    %204 = vector.broadcast %cst_49 : f32 to vector<1x256xf32>
    %205 = arith.maximumf %203, %204 : vector<1x256xf32>
    %c0_50 = arith.constant 0 : index
    %c0_51 = arith.constant 0 : index
    %c512_52 = arith.constant 512 : index
    %206 = vector.load %arg9[%c0_50, %c0_51, %c512_52] : memref<1x1x1536xf32, #tpu.memory_space<vmem>>, vector<1x1x256xf32>
    %207 = vector.shape_cast %206 : vector<1x1x256xf32> to vector<1x256xf32>
    %208 = vector.shape_cast %205 : vector<1x256xf32> to vector<1x1x256xf32>
    tpu.vector_store %arg9[%c0_50, %c0_51, %c512_52], %208 {strides = array<i32>} : memref<1x1x1536xf32, #tpu.memory_space<vmem>>, vector<1x1x256xf32>,
    %209 = vector.broadcast %31 : f32 to vector<1x256xf32>
    %210 = arith.mulf %155, %209 : vector<1x256xf32>
    %211 = vector.broadcast %58 : f32 to vector<1x256xf32>
    %212 = arith.mulf %155, %211 : vector<1x256xf32>
    %213 = vector.broadcast %85 : f32 to vector<1x256xf32>
    %214 = arith.mulf %155, %213 : vector<1x256xf32>
    %215 = vector.broadcast %40 : f32 to vector<1x256xf32>
    %216 = arith.mulf %159, %215 : vector<1x256xf32>
    %217 = arith.addf %210, %216 : vector<1x256xf32>
    %218 = vector.broadcast %67 : f32 to vector<1x256xf32>
    %219 = arith.mulf %159, %218 : vector<1x256xf32>
    %220 = arith.addf %212, %219 : vector<1x256xf32>
    %221 = vector.broadcast %94 : f32 to vector<1x256xf32>
    %222 = arith.mulf %159, %221 : vector<1x256xf32>
    %223 = arith.addf %214, %222 : vector<1x256xf32>
    %224 = vector.broadcast %49 : f32 to vector<1x256xf32>
    %225 = arith.mulf %163, %224 : vector<1x256xf32>
    %226 = arith.addf %217, %225 : vector<1x256xf32>
    %227 = vector.broadcast %76 : f32 to vector<1x256xf32>
    %228 = arith.mulf %163, %227 : vector<1x256xf32>
    %229 = arith.addf %220, %228 : vector<1x256xf32>
    %230 = vector.broadcast %103 : f32 to vector<1x256xf32>
    %231 = arith.mulf %163, %230 : vector<1x256xf32>
    %232 = arith.addf %223, %231 : vector<1x256xf32>
    %c0_53 = arith.constant 0 : index
    %c0_54 = arith.constant 0 : index
    %233 = vector.load %arg2[%c0_53, %c0_54] : memref<8x256xf32, #tpu.memory_space<vmem>>, vector<1x256xf32>
    %c17_i32 = arith.constant 17 : i32
    %234 = tpu.dynamic_rotate %155 by %c17_i32 dim 1 : vector<1x256xf32>, i32 -> vector<1x256xf32>
    %235 = arith.mulf %234, %233 : vector<1x256xf32>
    %236 = vector.broadcast %27 : f32 to vector<1x256xf32>
    %237 = arith.mulf %235, %236 : vector<1x256xf32>
    %238 = arith.addf %226, %237 : vector<1x256xf32>
    %239 = vector.broadcast %54 : f32 to vector<1x256xf32>
    %240 = arith.mulf %235, %239 : vector<1x256xf32>
    %241 = arith.addf %229, %240 : vector<1x256xf32>
    %242 = vector.broadcast %81 : f32 to vector<1x256xf32>
    %243 = arith.mulf %235, %242 : vector<1x256xf32>
    %244 = arith.addf %232, %243 : vector<1x256xf32>
    %c17_i32_55 = arith.constant 17 : i32
    %245 = tpu.dynamic_rotate %159 by %c17_i32_55 dim 1 : vector<1x256xf32>, i32 -> vector<1x256xf32>
    %246 = arith.mulf %245, %233 : vector<1x256xf32>
    %247 = vector.broadcast %36 : f32 to vector<1x256xf32>
    %248 = arith.mulf %246, %247 : vector<1x256xf32>
    %249 = arith.addf %238, %248 : vector<1x256xf32>
    %250 = vector.broadcast %63 : f32 to vector<1x256xf32>
    %251 = arith.mulf %246, %250 : vector<1x256xf32>
    %252 = arith.addf %241, %251 : vector<1x256xf32>
    %253 = vector.broadcast %90 : f32 to vector<1x256xf32>
    %254 = arith.mulf %246, %253 : vector<1x256xf32>
    %255 = arith.addf %244, %254 : vector<1x256xf32>
    %c17_i32_56 = arith.constant 17 : i32
    %256 = tpu.dynamic_rotate %163 by %c17_i32_56 dim 1 : vector<1x256xf32>, i32 -> vector<1x256xf32>
    %257 = arith.mulf %256, %233 : vector<1x256xf32>
    %258 = vector.broadcast %45 : f32 to vector<1x256xf32>
    %259 = arith.mulf %257, %258 : vector<1x256xf32>
    %260 = arith.addf %249, %259 : vector<1x256xf32>
    %261 = vector.broadcast %72 : f32 to vector<1x256xf32>
    %262 = arith.mulf %257, %261 : vector<1x256xf32>
    %263 = arith.addf %252, %262 : vector<1x256xf32>
    %264 = vector.broadcast %99 : f32 to vector<1x256xf32>
    %265 = arith.mulf %257, %264 : vector<1x256xf32>
    %266 = arith.addf %255, %265 : vector<1x256xf32>
    %c1_57 = arith.constant 1 : index
    %c0_58 = arith.constant 0 : index
    %267 = vector.load %arg2[%c1_57, %c0_58] : memref<8x256xf32, #tpu.memory_space<vmem>>, vector<1x256xf32>
    %c16_i32 = arith.constant 16 : i32
    %268 = tpu.dynamic_rotate %155 by %c16_i32 dim 1 : vector<1x256xf32>, i32 -> vector<1x256xf32>
    %269 = arith.mulf %268, %267 : vector<1x256xf32>
    %270 = vector.broadcast %28 : f32 to vector<1x256xf32>
    %271 = arith.mulf %269, %270 : vector<1x256xf32>
    %272 = arith.addf %260, %271 : vector<1x256xf32>
    %273 = vector.broadcast %55 : f32 to vector<1x256xf32>
    %274 = arith.mulf %269, %273 : vector<1x256xf32>
    %275 = arith.addf %263, %274 : vector<1x256xf32>
    %276 = vector.broadcast %82 : f32 to vector<1x256xf32>
    %277 = arith.mulf %269, %276 : vector<1x256xf32>
    %278 = arith.addf %266, %277 : vector<1x256xf32>
    %c16_i32_59 = arith.constant 16 : i32
    %279 = tpu.dynamic_rotate %159 by %c16_i32_59 dim 1 : vector<1x256xf32>, i32 -> vector<1x256xf32>
    %280 = arith.mulf %279, %267 : vector<1x256xf32>
    %281 = vector.broadcast %37 : f32 to vector<1x256xf32>
    %282 = arith.mulf %280, %281 : vector<1x256xf32>
    %283 = arith.addf %272, %282 : vector<1x256xf32>
    %284 = vector.broadcast %64 : f32 to vector<1x256xf32>
    %285 = arith.mulf %280, %284 : vector<1x256xf32>
    %286 = arith.addf %275, %285 : vector<1x256xf32>
    %287 = vector.broadcast %91 : f32 to vector<1x256xf32>
    %288 = arith.mulf %280, %287 : vector<1x256xf32>
    %289 = arith.addf %278, %288 : vector<1x256xf32>
    %c16_i32_60 = arith.constant 16 : i32
    %290 = tpu.dynamic_rotate %163 by %c16_i32_60 dim 1 : vector<1x256xf32>, i32 -> vector<1x256xf32>
    %291 = arith.mulf %290, %267 : vector<1x256xf32>
    %292 = vector.broadcast %46 : f32 to vector<1x256xf32>
    %293 = arith.mulf %291, %292 : vector<1x256xf32>
    %294 = arith.addf %283, %293 : vector<1x256xf32>
    %295 = vector.broadcast %73 : f32 to vector<1x256xf32>
    %296 = arith.mulf %291, %295 : vector<1x256xf32>
    %297 = arith.addf %286, %296 : vector<1x256xf32>
    %298 = vector.broadcast %100 : f32 to vector<1x256xf32>
    %299 = arith.mulf %291, %298 : vector<1x256xf32>
    %300 = arith.addf %289, %299 : vector<1x256xf32>
    %c2_61 = arith.constant 2 : index
    %c0_62 = arith.constant 0 : index
    %301 = vector.load %arg2[%c2_61, %c0_62] : memref<8x256xf32, #tpu.memory_space<vmem>>, vector<1x256xf32>
    %c15_i32 = arith.constant 15 : i32
    %302 = tpu.dynamic_rotate %155 by %c15_i32 dim 1 : vector<1x256xf32>, i32 -> vector<1x256xf32>
    %303 = arith.mulf %302, %301 : vector<1x256xf32>
    %304 = vector.broadcast %29 : f32 to vector<1x256xf32>
    %305 = arith.mulf %303, %304 : vector<1x256xf32>
    %306 = arith.addf %294, %305 : vector<1x256xf32>
    %307 = vector.broadcast %56 : f32 to vector<1x256xf32>
    %308 = arith.mulf %303, %307 : vector<1x256xf32>
    %309 = arith.addf %297, %308 : vector<1x256xf32>
    %310 = vector.broadcast %83 : f32 to vector<1x256xf32>
    %311 = arith.mulf %303, %310 : vector<1x256xf32>
    %312 = arith.addf %300, %311 : vector<1x256xf32>
    %c15_i32_63 = arith.constant 15 : i32
    %313 = tpu.dynamic_rotate %159 by %c15_i32_63 dim 1 : vector<1x256xf32>, i32 -> vector<1x256xf32>
    %314 = arith.mulf %313, %301 : vector<1x256xf32>
    %315 = vector.broadcast %38 : f32 to vector<1x256xf32>
    %316 = arith.mulf %314, %315 : vector<1x256xf32>
    %317 = arith.addf %306, %316 : vector<1x256xf32>
    %318 = vector.broadcast %65 : f32 to vector<1x256xf32>
    %319 = arith.mulf %314, %318 : vector<1x256xf32>
    %320 = arith.addf %309, %319 : vector<1x256xf32>
    %321 = vector.broadcast %92 : f32 to vector<1x256xf32>
    %322 = arith.mulf %314, %321 : vector<1x256xf32>
    %323 = arith.addf %312, %322 : vector<1x256xf32>
    %c15_i32_64 = arith.constant 15 : i32
    %324 = tpu.dynamic_rotate %163 by %c15_i32_64 dim 1 : vector<1x256xf32>, i32 -> vector<1x256xf32>
    %325 = arith.mulf %324, %301 : vector<1x256xf32>
    %326 = vector.broadcast %47 : f32 to vector<1x256xf32>
    %327 = arith.mulf %325, %326 : vector<1x256xf32>
    %328 = arith.addf %317, %327 : vector<1x256xf32>
    %329 = vector.broadcast %74 : f32 to vector<1x256xf32>
    %330 = arith.mulf %325, %329 : vector<1x256xf32>
    %331 = arith.addf %320, %330 : vector<1x256xf32>
    %332 = vector.broadcast %101 : f32 to vector<1x256xf32>
    %333 = arith.mulf %325, %332 : vector<1x256xf32>
    %334 = arith.addf %323, %333 : vector<1x256xf32>
    %c3_65 = arith.constant 3 : index
    %c0_66 = arith.constant 0 : index
    %335 = vector.load %arg2[%c3_65, %c0_66] : memref<8x256xf32, #tpu.memory_space<vmem>>, vector<1x256xf32>
    %c1_i32 = arith.constant 1 : i32
    %336 = tpu.dynamic_rotate %155 by %c1_i32 dim 1 : vector<1x256xf32>, i32 -> vector<1x256xf32>
    %337 = arith.mulf %336, %335 : vector<1x256xf32>
    %338 = vector.broadcast %30 : f32 to vector<1x256xf32>
    %339 = arith.mulf %337, %338 : vector<1x256xf32>
    %340 = arith.addf %328, %339 : vector<1x256xf32>
    %341 = vector.broadcast %57 : f32 to vector<1x256xf32>
    %342 = arith.mulf %337, %341 : vector<1x256xf32>
    %343 = arith.addf %331, %342 : vector<1x256xf32>
    %344 = vector.broadcast %84 : f32 to vector<1x256xf32>
    %345 = arith.mulf %337, %344 : vector<1x256xf32>
    %346 = arith.addf %334, %345 : vector<1x256xf32>
    %c1_i32_67 = arith.constant 1 : i32
    %347 = tpu.dynamic_rotate %159 by %c1_i32_67 dim 1 : vector<1x256xf32>, i32 -> vector<1x256xf32>
    %348 = arith.mulf %347, %335 : vector<1x256xf32>
    %349 = vector.broadcast %39 : f32 to vector<1x256xf32>
    %350 = arith.mulf %348, %349 : vector<1x256xf32>
    %351 = arith.addf %340, %350 : vector<1x256xf32>
    %352 = vector.broadcast %66 : f32 to vector<1x256xf32>
    %353 = arith.mulf %348, %352 : vector<1x256xf32>
    %354 = arith.addf %343, %353 : vector<1x256xf32>
    %355 = vector.broadcast %93 : f32 to vector<1x256xf32>
    %356 = arith.mulf %348, %355 : vector<1x256xf32>
    %357 = arith.addf %346, %356 : vector<1x256xf32>
    %c1_i32_68 = arith.constant 1 : i32
    %358 = tpu.dynamic_rotate %163 by %c1_i32_68 dim 1 : vector<1x256xf32>, i32 -> vector<1x256xf32>
    %359 = arith.mulf %358, %335 : vector<1x256xf32>
    %360 = vector.broadcast %48 : f32 to vector<1x256xf32>
    %361 = arith.mulf %359, %360 : vector<1x256xf32>
    %362 = arith.addf %351, %361 : vector<1x256xf32>
    %363 = vector.broadcast %75 : f32 to vector<1x256xf32>
    %364 = arith.mulf %359, %363 : vector<1x256xf32>
    %365 = arith.addf %354, %364 : vector<1x256xf32>
    %366 = vector.broadcast %102 : f32 to vector<1x256xf32>
    %367 = arith.mulf %359, %366 : vector<1x256xf32>
    %368 = arith.addf %357, %367 : vector<1x256xf32>
    %c4_69 = arith.constant 4 : index
    %c0_70 = arith.constant 0 : index
    %369 = vector.load %arg2[%c4_69, %c0_70] : memref<8x256xf32, #tpu.memory_space<vmem>>, vector<1x256xf32>
    %c255_i32 = arith.constant 255 : i32
    %370 = tpu.dynamic_rotate %155 by %c255_i32 dim 1 : vector<1x256xf32>, i32 -> vector<1x256xf32>
    %371 = arith.mulf %370, %369 : vector<1x256xf32>
    %372 = vector.broadcast %32 : f32 to vector<1x256xf32>
    %373 = arith.mulf %371, %372 : vector<1x256xf32>
    %374 = arith.addf %362, %373 : vector<1x256xf32>
    %375 = vector.broadcast %59 : f32 to vector<1x256xf32>
    %376 = arith.mulf %371, %375 : vector<1x256xf32>
    %377 = arith.addf %365, %376 : vector<1x256xf32>
    %378 = vector.broadcast %86 : f32 to vector<1x256xf32>
    %379 = arith.mulf %371, %378 : vector<1x256xf32>
    %380 = arith.addf %368, %379 : vector<1x256xf32>
    %c255_i32_71 = arith.constant 255 : i32
    %381 = tpu.dynamic_rotate %159 by %c255_i32_71 dim 1 : vector<1x256xf32>, i32 -> vector<1x256xf32>
    %382 = arith.mulf %381, %369 : vector<1x256xf32>
    %383 = vector.broadcast %41 : f32 to vector<1x256xf32>
    %384 = arith.mulf %382, %383 : vector<1x256xf32>
    %385 = arith.addf %374, %384 : vector<1x256xf32>
    %386 = vector.broadcast %68 : f32 to vector<1x256xf32>
    %387 = arith.mulf %382, %386 : vector<1x256xf32>
    %388 = arith.addf %377, %387 : vector<1x256xf32>
    %389 = vector.broadcast %95 : f32 to vector<1x256xf32>
    %390 = arith.mulf %382, %389 : vector<1x256xf32>
    %391 = arith.addf %380, %390 : vector<1x256xf32>
    %c255_i32_72 = arith.constant 255 : i32
    %392 = tpu.dynamic_rotate %163 by %c255_i32_72 dim 1 : vector<1x256xf32>, i32 -> vector<1x256xf32>
    %393 = arith.mulf %392, %369 : vector<1x256xf32>
    %394 = vector.broadcast %50 : f32 to vector<1x256xf32>
    %395 = arith.mulf %393, %394 : vector<1x256xf32>
    %396 = arith.addf %385, %395 : vector<1x256xf32>
    %397 = vector.broadcast %77 : f32 to vector<1x256xf32>
    %398 = arith.mulf %393, %397 : vector<1x256xf32>
    %399 = arith.addf %388, %398 : vector<1x256xf32>
    %400 = vector.broadcast %104 : f32 to vector<1x256xf32>
    %401 = arith.mulf %393, %400 : vector<1x256xf32>
    %402 = arith.addf %391, %401 : vector<1x256xf32>
    %c5_73 = arith.constant 5 : index
    %c0_74 = arith.constant 0 : index
    %403 = vector.load %arg2[%c5_73, %c0_74] : memref<8x256xf32, #tpu.memory_space<vmem>>, vector<1x256xf32>
    %c241_i32 = arith.constant 241 : i32
    %404 = tpu.dynamic_rotate %155 by %c241_i32 dim 1 : vector<1x256xf32>, i32 -> vector<1x256xf32>
    %405 = arith.mulf %404, %403 : vector<1x256xf32>
    %406 = vector.broadcast %33 : f32 to vector<1x256xf32>
    %407 = arith.mulf %405, %406 : vector<1x256xf32>
    %408 = arith.addf %396, %407 : vector<1x256xf32>
    %409 = vector.broadcast %60 : f32 to vector<1x256xf32>
    %410 = arith.mulf %405, %409 : vector<1x256xf32>
    %411 = arith.addf %399, %410 : vector<1x256xf32>
    %412 = vector.broadcast %87 : f32 to vector<1x256xf32>
    %413 = arith.mulf %405, %412 : vector<1x256xf32>
    %414 = arith.addf %402, %413 : vector<1x256xf32>
    %c241_i32_75 = arith.constant 241 : i32
    %415 = tpu.dynamic_rotate %159 by %c241_i32_75 dim 1 : vector<1x256xf32>, i32 -> vector<1x256xf32>
    %416 = arith.mulf %415, %403 : vector<1x256xf32>
    %417 = vector.broadcast %42 : f32 to vector<1x256xf32>
    %418 = arith.mulf %416, %417 : vector<1x256xf32>
    %419 = arith.addf %408, %418 : vector<1x256xf32>
    %420 = vector.broadcast %69 : f32 to vector<1x256xf32>
    %421 = arith.mulf %416, %420 : vector<1x256xf32>
    %422 = arith.addf %411, %421 : vector<1x256xf32>
    %423 = vector.broadcast %96 : f32 to vector<1x256xf32>
    %424 = arith.mulf %416, %423 : vector<1x256xf32>
    %425 = arith.addf %414, %424 : vector<1x256xf32>
    %c241_i32_76 = arith.constant 241 : i32
    %426 = tpu.dynamic_rotate %163 by %c241_i32_76 dim 1 : vector<1x256xf32>, i32 -> vector<1x256xf32>
    %427 = arith.mulf %426, %403 : vector<1x256xf32>
    %428 = vector.broadcast %51 : f32 to vector<1x256xf32>
    %429 = arith.mulf %427, %428 : vector<1x256xf32>
    %430 = arith.addf %419, %429 : vector<1x256xf32>
    %431 = vector.broadcast %78 : f32 to vector<1x256xf32>
    %432 = arith.mulf %427, %431 : vector<1x256xf32>
    %433 = arith.addf %422, %432 : vector<1x256xf32>
    %434 = vector.broadcast %105 : f32 to vector<1x256xf32>
    %435 = arith.mulf %427, %434 : vector<1x256xf32>
    %436 = arith.addf %425, %435 : vector<1x256xf32>
    %c6_77 = arith.constant 6 : index
    %c0_78 = arith.constant 0 : index
    %437 = vector.load %arg2[%c6_77, %c0_78] : memref<8x256xf32, #tpu.memory_space<vmem>>, vector<1x256xf32>
    %c240_i32 = arith.constant 240 : i32
    %438 = tpu.dynamic_rotate %155 by %c240_i32 dim 1 : vector<1x256xf32>, i32 -> vector<1x256xf32>
    %439 = arith.mulf %438, %437 : vector<1x256xf32>
    %440 = vector.broadcast %34 : f32 to vector<1x256xf32>
    %441 = arith.mulf %439, %440 : vector<1x256xf32>
    %442 = arith.addf %430, %441 : vector<1x256xf32>
    %443 = vector.broadcast %61 : f32 to vector<1x256xf32>
    %444 = arith.mulf %439, %443 : vector<1x256xf32>
    %445 = arith.addf %433, %444 : vector<1x256xf32>
    %446 = vector.broadcast %88 : f32 to vector<1x256xf32>
    %447 = arith.mulf %439, %446 : vector<1x256xf32>
    %448 = arith.addf %436, %447 : vector<1x256xf32>
    %c240_i32_79 = arith.constant 240 : i32
    %449 = tpu.dynamic_rotate %159 by %c240_i32_79 dim 1 : vector<1x256xf32>, i32 -> vector<1x256xf32>
    %450 = arith.mulf %449, %437 : vector<1x256xf32>
    %451 = vector.broadcast %43 : f32 to vector<1x256xf32>
    %452 = arith.mulf %450, %451 : vector<1x256xf32>
    %453 = arith.addf %442, %452 : vector<1x256xf32>
    %454 = vector.broadcast %70 : f32 to vector<1x256xf32>
    %455 = arith.mulf %450, %454 : vector<1x256xf32>
    %456 = arith.addf %445, %455 : vector<1x256xf32>
    %457 = vector.broadcast %97 : f32 to vector<1x256xf32>
    %458 = arith.mulf %450, %457 : vector<1x256xf32>
    %459 = arith.addf %448, %458 : vector<1x256xf32>
    %c240_i32_80 = arith.constant 240 : i32
    %460 = tpu.dynamic_rotate %163 by %c240_i32_80 dim 1 : vector<1x256xf32>, i32 -> vector<1x256xf32>
    %461 = arith.mulf %460, %437 : vector<1x256xf32>
    %462 = vector.broadcast %52 : f32 to vector<1x256xf32>
    %463 = arith.mulf %461, %462 : vector<1x256xf32>
    %464 = arith.addf %453, %463 : vector<1x256xf32>
    %465 = vector.broadcast %79 : f32 to vector<1x256xf32>
    %466 = arith.mulf %461, %465 : vector<1x256xf32>
    %467 = arith.addf %456, %466 : vector<1x256xf32>
    %468 = vector.broadcast %106 : f32 to vector<1x256xf32>
    %469 = arith.mulf %461, %468 : vector<1x256xf32>
    %470 = arith.addf %459, %469 : vector<1x256xf32>
    %c7_81 = arith.constant 7 : index
    %c0_82 = arith.constant 0 : index
    %471 = vector.load %arg2[%c7_81, %c0_82] : memref<8x256xf32, #tpu.memory_space<vmem>>, vector<1x256xf32>
    %c239_i32 = arith.constant 239 : i32
    %472 = tpu.dynamic_rotate %155 by %c239_i32 dim 1 : vector<1x256xf32>, i32 -> vector<1x256xf32>
    %473 = arith.mulf %472, %471 : vector<1x256xf32>
    %474 = vector.broadcast %35 : f32 to vector<1x256xf32>
    %475 = arith.mulf %473, %474 : vector<1x256xf32>
    %476 = arith.addf %464, %475 : vector<1x256xf32>
    %477 = vector.broadcast %62 : f32 to vector<1x256xf32>
    %478 = arith.mulf %473, %477 : vector<1x256xf32>
    %479 = arith.addf %467, %478 : vector<1x256xf32>
    %480 = vector.broadcast %89 : f32 to vector<1x256xf32>
    %481 = arith.mulf %473, %480 : vector<1x256xf32>
    %482 = arith.addf %470, %481 : vector<1x256xf32>
    %c239_i32_83 = arith.constant 239 : i32
    %483 = tpu.dynamic_rotate %159 by %c239_i32_83 dim 1 : vector<1x256xf32>, i32 -> vector<1x256xf32>
    %484 = arith.mulf %483, %471 : vector<1x256xf32>
    %485 = vector.broadcast %44 : f32 to vector<1x256xf32>
    %486 = arith.mulf %484, %485 : vector<1x256xf32>
    %487 = arith.addf %476, %486 : vector<1x256xf32>
    %488 = vector.broadcast %71 : f32 to vector<1x256xf32>
    %489 = arith.mulf %484, %488 : vector<1x256xf32>
    %490 = arith.addf %479, %489 : vector<1x256xf32>
    %491 = vector.broadcast %98 : f32 to vector<1x256xf32>
    %492 = arith.mulf %484, %491 : vector<1x256xf32>
    %493 = arith.addf %482, %492 : vector<1x256xf32>
    %c239_i32_84 = arith.constant 239 : i32
    %494 = tpu.dynamic_rotate %163 by %c239_i32_84 dim 1 : vector<1x256xf32>, i32 -> vector<1x256xf32>
    %495 = arith.mulf %494, %471 : vector<1x256xf32>
    %496 = vector.broadcast %53 : f32 to vector<1x256xf32>
    %497 = arith.mulf %495, %496 : vector<1x256xf32>
    %498 = arith.addf %487, %497 : vector<1x256xf32>
    %499 = vector.broadcast %80 : f32 to vector<1x256xf32>
    %500 = arith.mulf %495, %499 : vector<1x256xf32>
    %501 = arith.addf %490, %500 : vector<1x256xf32>
    %502 = vector.broadcast %107 : f32 to vector<1x256xf32>
    %503 = arith.mulf %495, %502 : vector<1x256xf32>
    %504 = arith.addf %493, %503 : vector<1x256xf32>
    %505 = vector.broadcast %108 : f32 to vector<1x256xf32>
    %506 = arith.addf %498, %505 : vector<1x256xf32>
    %cst_85 = arith.constant 0.000000e+00 : f32
    %507 = vector.broadcast %cst_85 : f32 to vector<1x256xf32>
    %508 = arith.maximumf %506, %507 : vector<1x256xf32>
    %c0_86 = arith.constant 0 : index
    %c0_87 = arith.constant 0 : index
    %c768_88 = arith.constant 768 : index
    %509 = vector.load %arg9[%c0_86, %c0_87, %c768_88] : memref<1x1x1536xf32, #tpu.memory_space<vmem>>, vector<1x1x256xf32>
    %510 = vector.shape_cast %509 : vector<1x1x256xf32> to vector<1x256xf32>
    %511 = vector.shape_cast %508 : vector<1x256xf32> to vector<1x1x256xf32>
    tpu.vector_store %arg9[%c0_86, %c0_87, %c768_88], %511 {strides = array<i32>} : memref<1x1x1536xf32, #tpu.memory_space<vmem>>, vector<1x1x256xf32>,
    %512 = vector.broadcast %109 : f32 to vector<1x256xf32>
    %513 = arith.addf %501, %512 : vector<1x256xf32>
    %cst_89 = arith.constant 0.000000e+00 : f32
    %514 = vector.broadcast %cst_89 : f32 to vector<1x256xf32>
    %515 = arith.maximumf %513, %514 : vector<1x256xf32>
    %c0_90 = arith.constant 0 : index
    %c0_91 = arith.constant 0 : index
    %c1024 = arith.constant 1024 : index
    %516 = vector.load %arg9[%c0_90, %c0_91, %c1024] : memref<1x1x1536xf32, #tpu.memory_space<vmem>>, vector<1x1x256xf32>
    %517 = vector.shape_cast %516 : vector<1x1x256xf32> to vector<1x256xf32>
    %518 = vector.shape_cast %515 : vector<1x256xf32> to vector<1x1x256xf32>
    tpu.vector_store %arg9[%c0_90, %c0_91, %c1024], %518 {strides = array<i32>} : memref<1x1x1536xf32, #tpu.memory_space<vmem>>, vector<1x1x256xf32>,
    %519 = vector.broadcast %110 : f32 to vector<1x256xf32>
    %520 = arith.addf %504, %519 : vector<1x256xf32>
    %cst_92 = arith.constant 0.000000e+00 : f32
    %521 = vector.broadcast %cst_92 : f32 to vector<1x256xf32>
    %522 = arith.maximumf %520, %521 : vector<1x256xf32>
    %c0_93 = arith.constant 0 : index
    %c0_94 = arith.constant 0 : index
    %c1280 = arith.constant 1280 : index
    %523 = vector.load %arg9[%c0_93, %c0_94, %c1280] : memref<1x1x1536xf32, #tpu.memory_space<vmem>>, vector<1x1x256xf32>
    %524 = vector.shape_cast %523 : vector<1x1x256xf32> to vector<1x256xf32>
    %525 = vector.shape_cast %522 : vector<1x256xf32> to vector<1x1x256xf32>
    tpu.vector_store %arg9[%c0_93, %c0_94, %c1280], %525 {strides = array<i32>} : memref<1x1x1536xf32, #tpu.memory_space<vmem>>, vector<1x1x256xf32>,
    return
  }
  func.func @transform_0(%arg0: i32) -> (i32, i32, i32) {
    %c0_i32 = arith.constant 0 : i32
    %c0_i32_0 = arith.constant 0 : i32
    %c0_i32_1 = arith.constant 0 : i32
    return %arg0, %c0_i32, %c0_i32_0 : i32, i32, i32
  }
  func.func @transform_1(%arg0: i32) -> (i32, i32) {
    %c0_i32 = arith.constant 0 : i32
    %c0_i32_0 = arith.constant 0 : i32
    %c0_i32_1 = arith.constant 0 : i32
    return %c0_i32, %c0_i32_0 : i32, i32
  }
  func.func @transform_2(%arg0: i32) -> i32 {
    %c0_i32 = arith.constant 0 : i32
    %c0_i32_0 = arith.constant 0 : i32
    return %c0_i32 : i32
  }
  func.func @transform_3(%arg0: i32) -> i32 {
    %c0_i32 = arith.constant 0 : i32
    %c0_i32_0 = arith.constant 0 : i32
    return %c0_i32 : i32
  }
  func.func @transform_4(%arg0: i32) -> i32 {
    %c0_i32 = arith.constant 0 : i32
    %c0_i32_0 = arith.constant 0 : i32
    return %c0_i32 : i32
  }
  func.func @transform_5(%arg0: i32) -> i32 {
    %c0_i32 = arith.constant 0 : i32
    %c0_i32_0 = arith.constant 0 : i32
    return %c0_i32 : i32
  }
  func.func @transform_6(%arg0: i32) -> i32 {
    %c0_i32 = arith.constant 0 : i32
    %c0_i32_0 = arith.constant 0 : i32
    return %c0_i32 : i32
  }
  func.func @transform_7(%arg0: i32) -> i32 {
    %c0_i32 = arith.constant 0 : i32
    %c0_i32_0 = arith.constant 0 : i32
    return %c0_i32 : i32
  }
  func.func @transform_8(%arg0: i32) -> (i32, i32, i32) {
    %c0_i32 = arith.constant 0 : i32
    %c0_i32_0 = arith.constant 0 : i32
    %c0_i32_1 = arith.constant 0 : i32
    return %arg0, %c0_i32, %c0_i32_0 : i32, i32, i32
  }
}

</mosaic_0001>

<bundles_post_ra>
// kernel: tpu_custom_call.1
= control target key start
LH: loop header
LB: loop body
LE: loop exit
PB: predicated region body
PF: predicated region fallthrough
CT: control target
= control target key end

     0   :  { %s4597_s0 = inlined_call_operand.hbm [shape: f32[2,1,1024], index: 0, kind: input, shape index: {}]   ;;  %s4598_s1 = inlined_call_operand.hbm [shape: f32[8,256], index: 1, kind: input, shape index: {}]   ;;  %s4599_s2 = inlined_call_operand.vmem [shape: f32[12], index: 2, kind: input, shape index: {}]   ;;  %s4600_s3 = inlined_call_operand.vmem [shape: f32[3], index: 3, kind: input, shape index: {}]   ;;  %s4601_s4 = inlined_call_operand.vmem [shape: f32[9], index: 4, kind: input, shape index: {}]   ;;  %s4602_s5 = inlined_call_operand.vmem [shape: f32[3], index: 5, kind: input, shape index: {}]   ;;  %s4603_s6 = inlined_call_operand.vmem [shape: f32[81], index: 6, kind: input, shape index: {}]   ;;  %s4604_s7 = inlined_call_operand.vmem [shape: f32[3], index: 7, kind: input, shape index: {}]   ;;  %s4605_s8 = inlined_call_operand.hbm [shape: f32[2,1,1536], index: 8, kind: output, shape index: {}]  }
   0x1   :  { %4705 = sst [smem:[#allocation87_spill]] %s4597_s0 }
   0x2   :  { %4706 = sst [smem:[#allocation88_spill]] %s4598_s1 }
   0x3   :  { %4707 = sst [smem:[#allocation89_spill]] %s4599_s2 }
   0x4   :  { %4708 = sst [smem:[#allocation90_spill]] %s4600_s3 }
   0x5   :  { %4709 = sst [smem:[#allocation91_spill]] %s4601_s4 }
   0x6   :  { %4710 = sst [smem:[#allocation92_spill]] %s4602_s5 }
   0x7   :  { %4711 = sst [smem:[#allocation93_spill]] %s4603_s6 }
   0x8   :  { %4712 = sst [smem:[#allocation94_spill]] %s4604_s7 }
   0x9   :  { %4713 = sst [smem:[#allocation95_spill]] %s4605_s8 }
   0xa   :  { %13 = vsyncpa [#allocation3], 0 }
   0xb   :  { %15 = vsyncpa [#allocation3 + $0x1], 0 }
   0xc   :  { %16 = vsyncpa [#allocation7], 0 }
   0xd   :  { %17 = vsyncpa [#allocation5], 0 }
   0xe   :  { %18 = vsyncpa [#allocation10], 0 }
   0xf   :  { %19 = vsyncpa [#allocation13], 0 }
  0x10   :  { %20 = vsyncpa [#allocation16], 0 }
  0x11   :  { %21 = vsyncpa [#allocation4], 0 }
  0x12   :  { %23 = vsyncpa [#allocation4 + $0x1], 0  ;;  %s3274_s27 = smov 0   ;;  %s3276_s28 = smov 0  }
  0x13   :  { %s3278_s29 = smov 0   ;;  %s3280_s30 = smov 0  }
  0x14 LB: > { %4714 = sst [smem:[#allocation25_spill]] %s3197_s27  ;;  %s3298_s12 = sadd.s32 4294967295, %s3209_s30   ;;  %s3209_s30 = sphi %s3280_s30, %s5001_s30   ;;  %s3205_s29 = sphi %s3278_s29, %s5004_s29   ;;  %s3201_s28 = sphi %s3276_s28, %s5003_s28   ;;  %s3197_s27 = sphi %s3274_s27, %s5002_s27  }
  0x15   : > { %4715 = sst [smem:[#allocation26_spill]] %s3201_s28  ;;  %p2723_p0 = scmp.ge.s32.totalorder %s3209_s30, 1 }
  0x16   : > { %4716 = sst [smem:[#allocation27_spill]] %s3205_s29  ;;  %p4606_p1 = scmp.eq.s32.totalorder %s3298_s12, 0 }
  0x17   : > { %4717 = sst [smem:[#allocation28_spill]] %s3209_s30  ;;  %p233_p2 = scmp.lt.s32.totalorder %s3209_s30, 3 }
  0x18   : > { %s4718_s3 = sld [smem:[#allocation90_spill]]  ;;  %s3211_s21 = smov [#allocation6]  }
  0x19   : > { %4719 = sst [smem:[#allocation29_spill]] %s3298_s12  ;;  %p3303_p3 = pnand %p2723_p0, %p233_p2 }
  0x1a   : > { %s4721_s5 = sld [smem:[#allocation92_spill]]  ;;  %s246_s22 = sshll.u32 %s3211_s21, 4  ;;  %s3324_s22 = int_to_ptr.vmem [resolvable:$true] %s246_s22 }
  0x1b   : > { %s4720_s13 = scalar_select %p3303_p3, 1, 0 }
  0x1c   : > { %p2887_p5 = pneg %p3303_p3  ;;  %s4722_s2 = sld [smem:[#allocation89_spill]] }
  0x1e   : > { %s268_s11 = sshll.u32 %s4718_s3, 4  ;;  %p3320_p6 = pnand %p2887_p5, %p4606_p1  ;;  %s269_s11 = int_to_ptr.vmem [resolvable:$true] %s268_s11 }
  0x1f   : > { %s2981_s23 = scalar_lea.vmem %s269_s11, 16  ;;  %p2989_p11 = scmp.lt.s32.totalorder %s269_s11, %s269_s11 }
  0x20   : > { %s290_s16 = sshll.u32 %s4721_s5, 4  ;;  %p2982_p7 = scmp.ne.s32.totalorder %s269_s11, %s2981_s23  ;;  %s3313_s16 = int_to_ptr.vmem [resolvable:$true] %s290_s16 }
  0x21   : > { %p3330_p8 = pneg %p3320_p6  ;;  %p2990_p12 = scmp.lt.s32.totalorder %s2981_s23, %s2981_s23 }
  0x22   : > { %s257_s19 = sshll.u32 %s4722_s2, 4  ;;  %s3326_s19 = int_to_ptr.vmem [resolvable:$true] %s257_s19 }
  0x23   : > { %p2984_p9 = pnand %p3330_p8, %p2982_p7  ;;  %p2991_p13 = por %p2990_p12, %p2989_p11 }
  0x25   : > { %p2985_p10 = pneg %p2984_p9 }
  0x27   : > { %p2992_p0 = pnand %p2991_p13, %p2985_p10 }
  0x29   : > { %2995 = shalt.err (!%p2992_p0)
}
  0x2a   : > { %s3212_s25 = smov [#allocation9]   ;;  %s2996_s26 = scalar_lea.vmem %s3313_s16, 16 }
  0x2b   : > { %2896 = dma.vmem_to_smem (!%p3320_p6), %s269_s11, 16, %s3212_s25, [#allocation10]  }
  0x2c   : > { %p2997_p2 = scmp.ne.s32.totalorder %s3313_s16, %s2996_s26  ;;  %p3004_p7 = scmp.lt.s32.totalorder %s3313_s16, %s3313_s16 }
  0x2d   : > { %p3005_p9 = scmp.lt.s32.totalorder %s2996_s26, %s2996_s26 }
  0x2e   : > { %p2999_p5 = pnand %p2997_p2, %p3330_p8 }
  0x2f   : > { %p3006_p1 = por %p3005_p9, %p3004_p7 }
  0x30   : > { %p3000_p4 = pneg %p2999_p5 }
  0x32   : > { %p3007_p11 = pnand %p3006_p1, %p3000_p4 }
  0x34   : > { %3010 = shalt.err (!%p3007_p11)
}
  0x35   : > { %s3213_s9 = smov [#allocation12]   ;;  %s3022_s10 = scalar_lea.vmem %s3324_s22, 256 }
  0x36   : > { %2902 = dma.vmem_to_smem (!%p3320_p6), %s3313_s16, 16, %s3213_s9, [#allocation13]  }
  0x37   : > { %p3023_p10 = scmp.ne.s32.totalorder %s3324_s22, %s3022_s10  ;;  %p3030_p0 = scmp.lt.s32.totalorder %s3324_s22, %s3324_s22 }
  0x38   : > { %p3031_p2 = scmp.lt.s32.totalorder %s3022_s10, %s3022_s10 }
  0x39   : > { %p3025_p12 = pnand %p3023_p10, %p3330_p8 }
  0x3a   : > { %p3032_p5 = por %p3031_p2, %p3030_p0 }
  0x3b   : > { %p3026_p13 = pneg %p3025_p12 }
  0x3d   : > { %p3033_p1 = pnand %p3032_p5, %p3026_p13 }
  0x3f   : > { %3036 = shalt.err (!%p3033_p1)
}
  0x40   : > { %s4725_s1 = sld [smem:[#allocation88_spill]]  ;;  %s3037_s15 = scalar_lea.vmem %s3326_s19, 16 }
  0x41   : > { %p3038_p4 = scmp.ne.s32.totalorder %s3326_s19, %s3037_s15  ;;  %p3045_p11 = scmp.lt.s32.totalorder %s3326_s19, %s3326_s19 }
  0x42   : > { %p3046_p10 = scmp.lt.s32.totalorder %s3037_s15, %s3037_s15 }
  0x43   : > { %p3040_p7 = pnand %p3038_p4, %p3330_p8 }
  0x44   : > { %p3047_p12 = por %p3046_p10, %p3045_p11 }
  0x45   : > { %p3041_p9 = pneg %p3040_p7 }
  0x46   : > { %2890 = dma.hbm_to_vmem [thread:$0]  (!%p3320_p6), %s4725_s1, 256, %s3324_s22, [#allocation7]  }
  0x47   : > { %p3048_p13 = pnand %p3047_p12, %p3041_p9 }
  0x49   : > { %3051 = shalt.err (!%p3048_p13)
}
  0x4a   : > { %s3214_s16 = smov [#allocation8]   ;;  %s4726_s4 = sld [smem:[#allocation91_spill]] }
  0x4b   : > { %2893 = dma.vmem_to_smem (!%p3320_p6), %s3326_s19, 16, %s3214_s16, [#allocation5]  }
  0x4c   : > { %s4727_s6 = sld [smem:[#allocation93_spill]] }
  0x50   : > { %s279_s21 = sshll.u32 %s4726_s4, 4  ;;  %s280_s21 = int_to_ptr.vmem [resolvable:$true] %s279_s21 }
  0x51   : > { %s3052_s26 = scalar_lea.vmem %s280_s21, 16  ;;  %p3060_p1 = scmp.lt.s32.totalorder %s280_s21, %s280_s21 }
  0x52   : > { %s301_s25 = sshll.u32 %s4727_s6, 4  ;;  %p3053_p0 = scmp.ne.s32.totalorder %s280_s21, %s3052_s26  ;;  %s302_s25 = int_to_ptr.vmem [resolvable:$true] %s301_s25 }
  0x53   : > { %p3061_p4 = scmp.lt.s32.totalorder %s3052_s26, %s3052_s26 }
  0x54   : > { %p3055_p2 = pnand %p3053_p0, %p3330_p8 }
  0x55   : > { %p3062_p7 = por %p3061_p4, %p3060_p1 }
  0x56   : > { %p3056_p5 = pneg %p3055_p2 }
  0x58   : > { %p3063_p9 = pnand %p3062_p7, %p3056_p5 }
  0x5a   : > { %3066 = shalt.err (!%p3063_p9)
}
  0x5b   : > { %s3215_s19 = smov [#allocation11]   ;;  %s3067_s9 = scalar_lea.vmem %s302_s25, 16 }
  0x5c   : > { %2899 = dma.vmem_to_smem (!%p3320_p6), %s280_s21, 16, %s3215_s19, [#allocation10]  }
  0x5d   : > { %p3068_p11 = scmp.ne.s32.totalorder %s302_s25, %s3067_s9  ;;  %p3075_p13 = scmp.lt.s32.totalorder %s302_s25, %s302_s25 }
  0x5e   : > { %p3076_p3 = scmp.lt.s32.totalorder %s3067_s9, %s3067_s9 }
  0x5f   : > { %p3070_p10 = pnand %p3068_p11, %p3330_p8 }
  0x60   : > { %p3077_p0 = por %p3076_p3, %p3075_p13 }
  0x61   : > { %p3071_p12 = pneg %p3070_p10 }
  0x63   : > { %p3078_p2 = pnand %p3077_p0, %p3071_p12 }
  0x65   : > { %3081 = shalt.err (!%p3078_p2)
}
  0x66   : > { %s3216_s10 = smov [#allocation14]   ;;  %s4728_s7 = sld [smem:[#allocation94_spill]] }
  0x67   : > { %2905 = dma.vmem_to_smem (!%p3320_p6), %s302_s25, 16, %s3216_s10, [#allocation13]  }
  0x6c   : > { %s312_s15 = sshll.u32 %s4728_s7, 4  ;;  %s313_s15 = int_to_ptr.vmem [resolvable:$true] %s312_s15 }
  0x6d   : > { %s3082_s16 = scalar_lea.vmem %s313_s15, 16  ;;  %p3090_p7 = scmp.lt.s32.totalorder %s313_s15, %s313_s15 }
  0x6e   : > { %p3083_p5 = scmp.ne.s32.totalorder %s313_s15, %s3082_s16  ;;  %p3091_p9 = scmp.lt.s32.totalorder %s3082_s16, %s3082_s16 }
  0x70   : > { %p3085_p1 = pnand %p3083_p5, %p3330_p8  ;;  %p3092_p3 = por %p3091_p9, %p3090_p7 }
  0x72   : > { %p3086_p4 = pneg %p3085_p1 }
  0x74   : > { %p3093_p11 = pnand %p3092_p3, %p3086_p4 }
  0x76   : > { %3096 = shalt.err (!%p3093_p11)
}
  0x77   : > { %s3217_s17 = smov [#allocation15]   ;;  %s2722_s24 = sadd.s32 4294967294, %s3209_s30  }
  0x78   : > { %2908 = dma.vmem_to_smem (!%p3320_p6), %s313_s15, 16, %s3217_s17, [#allocation16]  }
  0x79   : > { %s3391_s18 = sadd.s32 1, %s3209_s30   ;;  %s36_s20 = sadd.s32 1, %s3205_s29 }
  0x7a   : > { %4729 = sst [smem:[#allocation30_spill]] %s3391_s18  ;;  %s33_s21 = ssub.s32 %s3209_s30, %s3391_s18 }
  0x7b   : > { %p43_p8 = scmp.ne.s32.totalorder %s3205_s29, %s3201_s28  ;;  %p34_p10 = scmp.eq.s32.totalorder %s33_s21, 0 }
  0x7c   : > { %p44_p12 = scmp.eq.s32.totalorder %s3209_s30, 0  ;;  %p49_p13 = scmp.ne.s32.totalorder %s3201_s28, %s3197_s27 }
  0x7d   : > { %p220_p0 = scmp.eq.s32.totalorder %s3298_s12, 1  ;;  %p4731_p5 = scmp.eq.s32.totalorder %s3298_s12, 0 }
  0x7e   : > { %s3403_s22 = scalar_select %p34_p10, %s3205_s29, %s36_s20  }
  0x7f   : > { %p45_p2 = por %p44_p12, %p43_p8  ;;  %p3407_p1 = por %p4731_p5, %p49_p13 }
  0x80   : > { %4730 = sst [smem:[#allocation31_spill]] %s3403_s22  ;;  %p3411_p6 = por %p220_p0, %p43_p8 }
  0x81   : > { %s4732_s23 = scalar_select %p3407_p1, 1, 0 }
  0x82   : > { %s4733_s25 = scalar_select %p3411_p6, 1, 0 }
  0x83   : > { %p226_p4 = scmp.eq.s32.totalorder %s2722_s24, 1  ;;  %p2924_p7 = scmp.lt.s32.totalorder %s3209_s30, 2 }
  0x84   : > { %4734 = sst [smem:[#allocation32_spill]] %s4733_s25  ;;  %s323_s26 = sand.u32 1, %s3205_s29  }
  0x85   : > { %p3417_p9 = por %p226_p4, %p49_p13  ;;  %s2732_s9 = sshll.u32 %s323_s26, 3 }
  0x86   : > { %s2852_s10 = sshll.u32 %s3209_s30, 7  ;;  %s4737_s0 = sld [smem:[#allocation87_spill]] }
  0x87   : > { %s4735_s19 = scalar_select %p3417_p9, 1, 0 }
  0x88   : > { %s327_s16 = scalar_lea.vmem [#allocation2], %s2732_s9  ;;  %p3427_p3 = pnand %p2924_p7, %p45_p2 }
  0x89   : > { %4736 = sst [smem:[#allocation33_spill]] %s4735_s19  ;;  %s335_s17 = sshll.u32 %s327_s16, 4  ;;  %s336_s17 = int_to_ptr.vmem [resolvable:$true] %s335_s17 }
  0x8a   : > { %s324_s20 = scalar_lea.sflag [#allocation3], %s323_s26  ;;  %p3099_p8 = pneg %p3427_p3 }
  0x8c   : > { %s3425_s15 = scalar_lea.hbm %s4737_s0, %s2852_s10  ;;  %s3102_s14 = scalar_lea.hbm %s4737_s0, 256 }
  0x8d   : > { %s3097_s21 = scalar_lea.hbm %s3425_s15, 128  ;;  %p3103_p13 = scmp.lt.s32.totalorder %s3425_s15, %s4737_s0 }
  0x8e   : > { %p3098_p11 = scmp.ne.s32.totalorder %s3425_s15, %s3097_s21  ;;  %p3104_p0 = scmp.lt.s32.totalorder %s3102_s14, %s3097_s21 }
  0x90   : > { %p3100_p10 = pnand %p3099_p8, %p3098_p11  ;;  %p3105_p2 = por %p3104_p0, %p3103_p13 }
  0x92   : > { %p3101_p12 = pneg %p3100_p10 }
  0x94   : > { %p3106_p5 = pnand %p3105_p2, %p3101_p12 }
  0x96   : > { %3109 = shalt.err (!%p3106_p5)
}
  0x97   : > { %s3110_s16 = scalar_lea.vmem %s336_s17, 128  ;;  %s3218_s26 = smov [#allocation2]  }
  0x98   : > { %p3111_p4 = scmp.ne.s32.totalorder %s336_s17, %s3110_s16  ;;  %s3115_s2 = sshll.u32 %s3218_s26, 4  ;;  %s3116_s2 = int_to_ptr.vmem [resolvable:$false] %s3115_s2 }
  0x99   : > { %s3117_s3 = scalar_lea.vmem %s3116_s2, 256  ;;  %p3118_p11 = scmp.lt.s32.totalorder %s336_s17, %s3116_s2 }
  0x9a   : > { %p3113_p7 = pnand %p3111_p4, %p3099_p8  ;;  %p3119_p10 = scmp.lt.s32.totalorder %s3117_s3, %s3110_s16 }
  0x9c   : > { %p3114_p9 = pneg %p3113_p7  ;;  %p3120_p6 = por %p3119_p10, %p3118_p11 }
  0x9e   : > { %p3121_p1 = pnand %p3120_p6, %p3114_p9 }
  0xa0   : > { %3124 = shalt.err (!%p3121_p1)
}
  0xa1   : > { %2912 = dma.hbm_to_vmem [thread:$0]  (!%p3427_p3), %s3425_s15, 128, %s336_s17, %s324_s20  }
  0xa2   : > { %p4739_p12 = scmp.ne.s32.totalorder %s4720_s13, 0 }
  0xa4   : > { %344 = sbr.rel (%p4739_p12) target bundleno = 523 (0x20b), region = 52 }
  0xa9   : > { %s3448_s1 = sand.u32 1, %s3201_s28   ;;  %p4741_p8 = scmp.ne.s32.totalorder %s4732_s23, 0 }
  0xaa   : > { %4740 = sst [smem:[#allocation34_spill]] %s3448_s1  ;;  %s2736_s21 = sshll.u32 %s3448_s1, 3 }
  0xab   : > { %s347_s10 = scalar_lea.sflag [#allocation3], %s3448_s1  ;;  %s350_s2 = scalar_lea.vmem [#allocation2], %s2736_s21 }
  0xac   : > { %3168 = dma.done.wait (%p4741_p8), %s347_s10, 128  }
  0xad   : > { %3170 = vsyncadd (%p4741_p8), %s347_s10, 4294967168  ;;  %p4742_p1 = scmp.eq.s32.totalorder %s3298_s12, 0 }
  0xaf   : > { %3172 = dma.done.wait (%p4742_p1), [#allocation7], 256   ;;  %p4743_p6 = pmov %p4742_p1 }
  0xb0   : > { %p4744_p9 = pmov %p4742_p1 }
  0xb1   : > { %3174 = vsyncadd (%p4743_p6), [#allocation7], 4294967040 }
  0xb2   : > { %3176 = dma.done.wait (%p4744_p9), [#allocation5], 16   ;;  %p4745_p3 = pmov %p4742_p1 }
  0xb3   : > { %p4746_p13 = pmov %p4742_p1 }
  0xb4   : > { %3178 = vsyncadd (%p4745_p3), [#allocation5], 4294967280 }
  0xb5   : > { %3180 = dma.done.wait (%p4746_p13), [#allocation10], 32   ;;  %p4747_p0 = pmov %p4742_p1 }
  0xb7   : > { %3182 = vsyncadd (%p4747_p0), [#allocation10], 4294967264  ;;  %p4748_p2 = pmov %p4747_p0 }
  0xb8   : > { %p4749_p5 = pmov %p4747_p0 }
  0xb9   : > { %3184 = dma.done.wait (%p4748_p2), [#allocation13], 32  }
  0xba   : > { %3186 = vsyncadd (%p4749_p5), [#allocation13], 4294967264  ;;  %p4750_p4 = pmov %p4747_p0 }
  0xbb   : > { %p4751_p7 = pmov %p4747_p0 }
  0xbc   : > { %3188 = dma.done.wait (%p4750_p4), [#allocation16], 16  }
  0xbd   : > { %3190 = vsyncadd (%p4751_p7), [#allocation16], 4294967280 }
  0xbe   : > { %383 = sfence }
  0xbf   : > { %s2747_s3 = sld [smem:[#allocation8 + $0x4]]  ;;  %v523_v0 = vld [vmem:[%s350_s2] sm:$0x3]  ;;  %v530_v1 = vld [vmem:[%s350_s2 + $0x2] sm:$0x3]  ;;  %v4683_v9 = vlaneseq  ;;  %s3224_s19 = smov 113  }
  0xc0   : > { %s2748_s13 = sld [smem:[#allocation8 + $0x5]]  ;;  %v540_v3 = vld [vmem:[%s350_s2 + $0x4] sm:$0x3]  ;;  %v550_v6 = vld [vmem:[%s350_s2 + $0x6] sm:$0x3] }
  0xc1   : > { %s2749_s23 = sld [smem:[#allocation8 + $0x6]]  ;;  %v3481_v16 = vshrl.u32 %v4683_v9, 7  ;;  %v3227_v56 = vmov 1966171168  }
  0xc2   : > { %s2750_s15 = sld [smem:[#allocation8 + $0x7]]  ;;  %v674_v57 = vunpack.c.l.s4 %v3227_v56 }
  0xc3   : > { %s3476_s17 = sld [smem:[#allocation9 + $0x1]]  ;;  %v3485_v28 = vsub.s32 0, %v3481_v16  ;;  %v3488_v31 = vsub.s32 1, %v3481_v16 }
  0xc4   : > { %s412_s24 = sld [smem:[#allocation8]] }
  0xc5   : > { %v526_v2 = vstv %s2747_s3  ;;  %s2744_s20 = sld [smem:[#allocation8 + $0x1]]  ;;  %s3219_s3 = smov 17  }
  0xc6   : > { %v527_v4 = vmul.f32 %v526_v2, %v523_v0  ;;  %v534_v5 = vstv %s2748_s13  ;;  %s2745_s11 = sld [smem:[#allocation8 + $0x2]]  ;;  %s3220_s13 = smov 16  }
  0xc7   : > { %v535_v7 = vmul.f32 %v534_v5, %v530_v1  ;;  %v544_v8 = vstv %s2749_s23  ;;  %s2746_s14 = sld [smem:[#allocation8 + $0x3]]  ;;  %s3221_s23 = smov 15  }
  0xc8   : > { %v545_v10 = vmul.f32 %v544_v8, %v540_v3  ;;  %v554_v11 = vstv %s2750_s15  ;;  %s3478_s9 = sld [smem:[#allocation9]]  ;;  %s3222_s15 = smov 1  }
  0xc9   : > { %v536_v12 = vadd.f32 %v535_v7, %v527_v4  ;;  %v555_v13 = vmul.f32 %v554_v11, %v550_v6  ;;  %s2751_s16 = sld [smem:[#allocation8 + $0x8]]  ;;  %v563_v19 = vstv %s3476_s17 }
  0xca   : > { %v524_v14 = vstv %s412_s24  ;;  %s2752_s26 = sld [smem:[#allocation8 + $0x9]] }
  0xcb   : > { %v546_v15 = vadd.f32 %v545_v10, %v536_v12  ;;  %v525_v17 = vmul.f32 %v524_v14, %v523_v0  ;;  %v531_v18 = vstv %s2744_s20  ;;  %s2753_s21 = sld [smem:[#allocation8 + $0xa]]  ;;  %v633_v10 = vld [vmem:[#allocation6] ss:$8 sm:$0x3] }
  0xcc   : > { %v532_v20 = vmul.f32 %v531_v18, %v530_v1  ;;  %v541_v21 = vstv %s2745_s11  ;;  %s2754_s10 = sld [smem:[#allocation8 + $0xb]]  ;;  %v904_v18 = vld [vmem:[#allocation6 + $0x1] ss:$8 sm:$0x3] }
  0xcd   : > { %v556_v22 = vadd.f32 %v555_v13, %v546_v15  ;;  %v542_v23 = vmul.f32 %v541_v21, %v540_v3  ;;  %v551_v24 = vstv %s2746_s14  ;;  %s2756_s2 = sld [smem:[#allocation9 + $0x2]]  ;;  %v3712_v13 = vand.u32 127, %v4683_v9 }
  0xce   : > { %v533_v25 = vadd.f32 %v532_v20, %v525_v17  ;;  %v552_v26 = vmul.f32 %v551_v24, %v550_v6  ;;  %v560_v35 = vstv %s3478_s9  ;;  %s3540_s17 = sld [smem:[#allocation14 + $0x9]]  ;;  %v3724_v20 = vrot.slane %v633_v10, %v3488_v31 }
  0xcf   : > { %v564_v27 = vadd.f32 %v563_v19, %v556_v22  ;;  %v528_v29 = vstv %s2751_s16  ;;  %s3542_s24 = sld [smem:[#allocation14 + $0x24]]  ;;  %v3721_v19 = vrot.slane %v633_v10, %v3485_v28  ;;  %vm651_vm0 = vcmp.lt.s32.totalorder %v3712_v13, 17 }
  0xd0   : > { %v543_v30 = vadd.f32 %v542_v23, %v533_v25  ;;  %v529_v32 = vmul.f32 %v528_v29, %v523_v0  ;;  %v537_v33 = vstv %s2752_s26  ;;  %s3544_s20 = sld [smem:[#allocation14 + $0x3f]]  ;;  %v675_v0 = vunpack.c.0.s8 %v674_v57 }
  0xd1   : > { %v3490_v34 = vmax.f32 %v564_v27, 0.0  ;;  %v538_v36 = vmul.f32 %v537_v33, %v530_v1  ;;  %v547_v37 = vstv %s2753_s21  ;;  %s3547_s11 = sld [smem:[#allocation14]]  ;;  %vm909_vm1 = vcmp.lt.s32.totalorder %v3712_v13, 16 }
  0xd2   : > { %v553_v38 = vadd.f32 %v552_v26, %v543_v30  ;;  %v548_v39 = vmul.f32 %v547_v37, %v540_v3  ;;  %v557_v40 = vstv %s2754_s10  ;;  %s3550_s14 = sld [smem:[#allocation14 + $0x4]]  ;;  %v3707_v12 = vsub.s32 %v675_v0, %v3481_v16 }
  0xd3   : > { %v3495_v41 = vrot.slane %v3490_v34, %v3485_v28  ;;  %v539_v42 = vadd.f32 %v538_v36, %v529_v32  ;;  %v558_v43 = vmul.f32 %v557_v40, %v550_v6  ;;  %v3500_v45 = vrot.slane %v3490_v34, %v3488_v31  ;;  %s3552_s9 = sld [smem:[#allocation14 + $0xd]] }
  0xd4   : > { %v561_v44 = vadd.f32 %v560_v35, %v553_v38  ;;  %v566_v48 = vstv %s2756_s2  ;;  %4752 = sst [smem:[#allocation35_spill]] %s3540_s17  ;;  %v752_v23 = vstv %s3540_s17  ;;  %v3738_v30 = vrot.slane %v904_v18, %v3485_v28  ;;  %v1140_v38 = vld [vmem:[#allocation6 + $0x2] ss:$8 sm:$0x3] }
  0xd5   : > { %744 = vrot.lane.b32.xlu1 %v3495_v41, %s3219_s3  ;;  %v549_v46 = vadd.f32 %v548_v39, %v539_v42  ;;  %4753 = sst [smem:[#allocation36_spill]] %s3542_s24  ;;  %v774_v24 = vstv %s3542_s24  ;;  %v3741_v32 = vrot.slane %v904_v18, %v3488_v31  ;;  %v1848_v18 = vld [vmem:[#allocation6 + $0x5] ss:$8 sm:$0x3]  ;;  %vm1145_vm2 = vcmp.lt.s32.totalorder %v3712_v13, 15 }
  0xd6   : > { %v3502_v47 = vmax.f32 %v561_v44, 0.0  ;;  %4754 = sst [smem:[#allocation37_spill]] %s3544_s20  ;;  %v796_v25 = vstv %s3544_s20  ;;  %vm1381_vm3 = vcmp.lt.s32.totalorder %v3712_v13, 1  ;;  %vm1617_vm4 = vcmp.lt.s32.totalorder %v3712_v13, 127 }
  0xd7   : > { %v559_v49 = vadd.f32 %v558_v43, %v549_v46  ;;  %4755 = sst [smem:[#allocation38_spill]] %s3547_s11  ;;  %v667_v26 = vstv %s3547_s11  ;;  %vm1853_vm5 = vcmp.lt.s32.totalorder %v3712_v13, 113  ;;  %vm2089_vm6 = vcmp.lt.s32.totalorder %v3712_v13, 112 }
  0xd8   : > { %v3506_v50 = vrot.slane %v3502_v47, %v3485_v28  ;;  %v3512_v52 = vrot.slane %v3502_v47, %v3488_v31  ;;  %s3554_s16 = sld [smem:[#allocation14 + $0x16]]  ;;  %v609_v58 = vstv %s3550_s14  ;;  %vm2325_vm7 = vcmp.lt.s32.totalorder %v3712_v13, 111 }
  0xd9   : > { %746 = vrot.lane.b32.xlu1 %v3500_v45, %s3219_s3  ;;  %v567_v51 = vadd.f32 %v566_v48, %v559_v49  ;;  %s3557_s26 = sld [smem:[#allocation14 + $0x1b]]  ;;  %v615_v60 = vstv %s3552_s9  ;;  %v610_v3 = vmul.f32 %v609_v58, %v3502_v47 }
  0xda   : > { %645 = vrot.lane.b32.xlu0 %v3506_v50, %s3219_s3  ;;  %s3560_s21 = sld [smem:[#allocation14 + $0x1f]]  ;;  %v616_v1 = vmul.f32 %v615_v60, %v3490_v34 }
  0xdb   : > { %v3514_v53 = vmax.f32 %v567_v51, 0.0  ;;  %s3562_s10 = sld [smem:[#allocation14 + $0x28]]  ;;  %v3772_v51 = vrot.slane %v1140_v38, %v3488_v31 }
  0xdc   : > { %s3564_s2 = sld [smem:[#allocation14 + $0x31]]  ;;  %v617_v17 = vadd.f32 %v616_v1, %v610_v3 }
  0xdd   : > { %v3518_v54 = vrot.slane %v3514_v53, %v3488_v31  ;;  %v3523_v55 = vrot.slane %v3514_v53, %v3485_v28  ;;  %s3572_s0 = sld [smem:[#allocation14 + $0x43]] }
  0xde   : > { %647 = vrot.lane.b32.xlu0 %v3512_v52, %s3219_s3  ;;  %s3574_s4 = sld [smem:[#allocation14 + $0x4c]]  ;;  %v624_v6 = vstv %s3554_s16 }
  0xdf   : > { %831 = vrot.lane.b32.xlu1 %v3518_v54, %s3219_s3  ;;  %4756 = sst [smem:[#allocation39_spill]] %s3557_s26  ;;  %v625_v14 = vmul.f32 %v624_v6, %v3514_v53  ;;  %v689_v27 = vstv %s3557_s26 }
  0xe0   : > { %s3577_s5 = sld [smem:[#allocation14 + $0x12]]  ;;  %v611_v59 = vstv %s3560_s21 }
  0xe1   : > { %s3580_s6 = sld [smem:[#allocation14 + $0x2d]]  ;;  %v618_v61 = vstv %s3562_s10  ;;  %v612_v4 = vmul.f32 %v611_v59, %v3502_v47  ;;  %v3745_v33 = vadd.f32 %v625_v14, %v617_v17  ;;  %v2320_v14 = vld [vmem:[#allocation6 + $0x7] ss:$8 sm:$0x3] }
  0xe2   : > { %829 = vrot.lane.b32.xlu0 %v3523_v55, %s3219_s3  ;;  %s3567_s3 = sld [smem:[#allocation14 + $0x36]]  ;;  %v619_v2 = vmul.f32 %v618_v61, %v3490_v34  ;;  %v627_v7 = vstv %s3564_s2  ;;  %v3880_v9 = vrot.slane %v2320_v14, %v3485_v28 }
  0xe3   : > { %907 = vrot.lane.b32.xlu1 %v3512_v52, %s3220_s13  ;;  %s3584_s7 = sld [smem:[#allocation14 + $0x1]]  ;;  %v621_v63 = vstv %s3572_s0  ;;  %v628_v15 = vmul.f32 %v627_v7, %v3514_v53 }
  0xe4   : > { %s3587_s22 = sld [smem:[#allocation14 + $0x1c]]  ;;  %v622_v5 = vmul.f32 %v621_v63, %v3490_v34  ;;  %v630_v11 = vstv %s3574_s4  ;;  %v620_v16 = vadd.f32 %v619_v2, %v612_v4  ;;  %v1612_v2 = vld [vmem:[#allocation6 + $0x4] ss:$8 sm:$0x3]  ;;  %v3883_v4 = vrot.slane %v2320_v14, %v3488_v31 }
  0xe5   : > { %s3590_s29 = sld [smem:[#allocation14 + $0x37]]  ;;  %v631_v21 = vmul.f32 %v630_v11, %v3514_v53  ;;  %v3816_v17 = vrot.slane %v1612_v2, %v3488_v31  ;;  %v2084_v11 = vld [vmem:[#allocation6 + $0x6] ss:$8 sm:$0x3] }
  0xe6   : > { %905 = vrot.lane.b32.xlu0 %v3506_v50, %s3220_s13  ;;  %4758 = sst [smem:[#allocation41_spill]] %s3577_s5  ;;  %v3747_v35 = vadd.f32 %v628_v15, %v620_v16  ;;  %v837_v36 = vstv %s3577_s5  ;;  %v3813_v15 = vrot.slane %v1612_v2, %v3485_v28  ;;  %v3853_v6 = vrot.slane %v2084_v11, %v3485_v28 }
  0xe7   : > { %993 = vrot.lane.b32.xlu1 %v3500_v45, %s3220_s13  ;;  %4759 = sst [smem:[#allocation42_spill]] %s3580_s6  ;;  %v859_v37 = vstv %s3580_s6  ;;  %v3858_v2 = vrot.slane %v2084_v11, %v3488_v31 }
  0xe8   : > { %4757 = sst [smem:[#allocation40_spill]] %s3567_s3  ;;  %v711_v29 = vstv %s3567_s3 }
  0xe9   : > { %4761 = sst [smem:[#allocation44_spill]] %s3584_s7 }
  0xea   : > { %991 = vrot.lane.b32.xlu0 %v3495_v41, %s3220_s13  ;;  %4762 = sst [smem:[#allocation45_spill]] %s3587_s22  ;;  %v947_v42 = vstv %s3587_s22 }
  0xeb   : > { %1067 = vrot.lane.b32.xlu1 %v3518_v54, %s3220_s13  ;;  %4763 = sst [smem:[#allocation46_spill]] %s3590_s29  ;;  %v969_v43 = vstv %s3590_s29 }
  0xec   : > { %s3592_s28 = sld [smem:[#allocation14 + $0xa]] }
  0xed   : > { %s3594_s18 = sld [smem:[#allocation14 + $0x25]] }
  0xee   : > { %1065 = vrot.lane.b32.xlu0 %v3523_v55, %s3220_s13  ;;  %s3223_s13 = smov 127   ;;  %s3597_s30 = sld [smem:[#allocation14 + $0x40]] }
  0xef   : > { %1143 = vrot.lane.b32.xlu1 %v3512_v52, %s3221_s23  ;;  %s3600_s27 = sld [smem:[#allocation14 + $0x13]] }
  0xf0   : > { %s3602_s8 = sld [smem:[#allocation14 + $0x2e]] }
  0xf1   : > { %s3604_s25 = sld [smem:[#allocation14 + $0x49]] }
  0xf2   : > { %1141 = vrot.lane.b32.xlu0 %v3506_v50, %s3221_s23  ;;  %4764 = sst [smem:[#allocation47_spill]] %s3592_s28  ;;  %v999_v44 = vstv %s3592_s28 }
  0xf3   : > { %1229 = vrot.lane.b32.xlu1 %v3500_v45, %s3221_s23  ;;  %4765 = sst [smem:[#allocation48_spill]] %s3594_s18 }
  0xf4   : > { %4766 = sst [smem:[#allocation49_spill]] %s3597_s30 }
  0xf5   : > { %4767 = sst [smem:[#allocation50_spill]] %s3600_s27 }
  0xf6   : > { %1227 = vrot.lane.b32.xlu0 %v3495_v41, %s3221_s23  ;;  %4768 = sst [smem:[#allocation51_spill]] %s3602_s8 }
  0xf7   : > { %1303 = vrot.lane.b32.xlu1 %v3518_v54, %s3221_s23  ;;  %4769 = sst [smem:[#allocation52_spill]] %s3604_s25 }
  0xf8   : > { %s3607_s12 = sld [smem:[#allocation14 + $0x2]] }
  0xf9   : > { %s3610_s1 = sld [smem:[#allocation14 + $0x1d]] }
  0xfa   : > { %1301 = vrot.lane.b32.xlu0 %v3523_v55, %s3221_s23  ;;  %s3570_s23 = sld [smem:[#allocation14 + $0x3a]] }
  0xfb   : > { %1379 = vrot.lane.b32.xlu1 %v3512_v52, %s3222_s15  ;;  %s3614_s30 = sld [smem:[#allocation14 + $0xb]] }
  0xfc   : > { %s3617_s18 = sld [smem:[#allocation14 + $0x26]] }
  0xfd   : > { %s3620_s8 = sld [smem:[#allocation14 + $0x41]] }
  0xfe   : > { %1377 = vrot.lane.b32.xlu0 %v3506_v50, %s3222_s15  ;;  %4770 = sst [smem:[#allocation53_spill]] %s3607_s12 }
  0xff   : > { %1465 = vrot.lane.b32.xlu1 %v3500_v45, %s3222_s15  ;;  %4771 = sst [smem:[#allocation54_spill]] %s3610_s1  ;;  %s3225_s1 = smov 112  }
 0x100   : > { %s3622_s25 = sld [smem:[#allocation14 + $0x14]]  ;;  %v613_v62 = vstv %s3570_s23 }
 0x101   : > { %4773 = sst [smem:[#allocation56_spill]] %s3614_s30  ;;  %v614_v8 = vmul.f32 %v613_v62, %v3502_v47 }
 0x102   : > { %1463 = vrot.lane.b32.xlu0 %v3495_v41, %s3222_s15  ;;  %4774 = sst [smem:[#allocation57_spill]] %s3617_s18 }
 0x103   : > { %1539 = vrot.lane.b32.xlu1 %v3518_v54, %s3222_s15  ;;  %4775 = sst [smem:[#allocation58_spill]] %s3620_s8  ;;  %v623_v22 = vadd.f32 %v622_v5, %v614_v8 }
 0x104   : > { %s3624_s27 = sld [smem:[#allocation14 + $0x2f]] }
 0x105   : > { %s3627_s12 = sld [smem:[#allocation14 + $0x4a]]  ;;  %v3753_v39 = vadd.f32 %v631_v21, %v623_v22  ;;  %v3834_v22 = vrot.slane %v1848_v18, %v3485_v28 }
 0x106   : > { %1537 = vrot.lane.b32.xlu0 %v3523_v55, %s3222_s15  ;;  %s3582_s15 = sld [smem:[#allocation14 + $0x48]] }
 0x107   : > { %1615 = vrot.lane.b32.xlu1 %v3512_v52, %s3223_s13  ;;  %4776 = sst [smem:[#allocation59_spill]] %s3622_s25 }
 0x108   : > { %s3630_s30 = sld [smem:[#allocation14 + $0x3]] }
 0x109   : > { %s3634_s18 = sld [smem:[#allocation14 + $0x39]] }
 0x10a   : > { %1613 = vrot.lane.b32.xlu0 %v3506_v50, %s3223_s13  ;;  %4777 = sst [smem:[#allocation60_spill]] %s3624_s27 }
 0x10b   : > { %1701 = vrot.lane.b32.xlu1 %v3500_v45, %s3223_s13  ;;  %4778 = sst [smem:[#allocation61_spill]] %s3627_s12 }
 0x10c   : > { %4760 = sst [smem:[#allocation43_spill]] %s3582_s15  ;;  %v881_v40 = vstv %s3582_s15 }
 0x10d   : > { %s3637_s8 = sld [smem:[#allocation14 + $0xc]] }
 0x10e   : > { %1699 = vrot.lane.b32.xlu0 %v3495_v41, %s3223_s13  ;;  %s3640_s27 = sld [smem:[#allocation14 + $0x27]] }
 0x10f   : > { %1775 = vrot.lane.b32.xlu1 %v3518_v54, %s3223_s13  ;;  %4780 = sst [smem:[#allocation63_spill]] %s3634_s18 }
 0x110   : > { %s3644_s12 = sld [smem:[#allocation14 + $0x15]] }
 0x111   : > { %s3647_s25 = sld [smem:[#allocation14 + $0x30]] }
 0x112   : > { %1773 = vrot.lane.b32.xlu0 %v3523_v55, %s3223_s13  ;;  %s3612_s13 = sld [smem:[#allocation14 + $0x38]] }
 0x113   : > { %1851 = vrot.lane.b32.xlu1 %v3512_v52, %s3224_s19  ;;  %4781 = sst [smem:[#allocation64_spill]] %s3637_s8 }
 0x114   : > { %4782 = sst [smem:[#allocation65_spill]] %s3640_s27 }
 0x115   : > { %s3652_s18 = sld [smem:[#allocation14 + $0x5]] }
 0x116   : > { %1849 = vrot.lane.b32.xlu0 %v3506_v50, %s3224_s19  ;;  %4784 = sst [smem:[#allocation67_spill]] %s3644_s12  ;;  %s3226_s12 = smov 111  }
 0x117   : > { %1937 = vrot.lane.b32.xlu1 %v3500_v45, %s3224_s19  ;;  %4785 = sst [smem:[#allocation68_spill]] %s3647_s25 }
 0x118   : > { %4772 = sst [smem:[#allocation55_spill]] %s3612_s13 }
 0x119   : > { %s3632_s13 = sld [smem:[#allocation14 + $0x1e]] }
 0x11a   : > { %1935 = vrot.lane.b32.xlu0 %v3495_v41, %s3224_s19  ;;  %s3654_s8 = sld [smem:[#allocation14 + $0x20]] }
 0x11b   : > { %2011 = vrot.lane.b32.xlu1 %v3518_v54, %s3224_s19  ;;  %4787 = sst [smem:[#allocation70_spill]] %s3652_s18 }
 0x11c   : > { %s3661_s25 = sld [smem:[#allocation14 + $0xe]] }
 0x11d   : > { %s3665_s18 = sld [smem:[#allocation14 + $0x44]] }
 0x11e   : > { %2009 = vrot.lane.b32.xlu0 %v3523_v55, %s3224_s19  ;;  %s3642_s19 = sld [smem:[#allocation14 + $0x42]] }
 0x11f   : > { %2087 = vrot.lane.b32.xlu1 %v3512_v52, %s3225_s1  ;;  %4779 = sst [smem:[#allocation62_spill]] %s3632_s13 }
 0x120   : > { %s3650_s13 = sld [smem:[#allocation14 + $0x4b]] }
 0x121   : > { %s3695_s0 = sld [smem:[#allocation14 + $0x3c]] }
 0x122   : > { %2085 = vrot.lane.b32.xlu0 %v3506_v50, %s3225_s1  ;;  %4789 = sst [smem:[#allocation72_spill]] %s3661_s25 }
 0x123   : > { %2173 = vrot.lane.b32.xlu1 %v3500_v45, %s3225_s1  ;;  %4791 = sst [smem:[#allocation74_spill]] %s3665_s18 }
 0x124   : > { %4783 = sst [smem:[#allocation66_spill]] %s3642_s19 }
 0x125   : > { %s3657_s19 = sld [smem:[#allocation14 + $0x3b]] }
 0x126   : > { %2171 = vrot.lane.b32.xlu0 %v3495_v41, %s3225_s1  ;;  %4786 = sst [smem:[#allocation69_spill]] %s3650_s13 }
 0x127   : > { %2247 = vrot.lane.b32.xlu1 %v3518_v54, %s3225_s1  ;;  %s3663_s13 = sld [smem:[#allocation14 + $0x29]] }
 0x128   : > { %s3683_s18 = sld [smem:[#allocation14 + $0x6]] }
 0x129   : > { %s3701_s14 = sld [smem:[#allocation14 + $0xf]] }
 0x12a   : > { %2245 = vrot.lane.b32.xlu0 %v3523_v55, %s3225_s1  ;;  %s3669_s1 = sld [smem:[#allocation14 + $0x17]] }
 0x12b   : > { %4788 = sst [smem:[#allocation71_spill]] %s3657_s19  ;;  %2323 = vrot.lane.b32.xlu1 %v3512_v52, %s3226_s12  ;;  %v1376_v52 = vld [vmem:[#allocation6 + $0x3] ss:$8 sm:$0x3] }
 0x12c   : > { %s3673_s19 = sld [smem:[#allocation14 + $0x32]]  ;;  %v3792_v0 = vrot.slane %v1376_v52, %v3485_v28  ;;  %v3795_v1 = vrot.slane %v1376_v52, %v3488_v31  ;;  %v3837_v52 = vrot.slane %v1848_v18, %v3488_v31 }
 0x12d   : > { %4790 = sst [smem:[#allocation73_spill]] %s3663_s13 }
 0x12e   : > { %2321 = vrot.lane.b32.xlu0 %v3506_v50, %s3226_s12  ;;  %s3679_s13 = sld [smem:[#allocation14 + $0x4d]]  ;;  %v3769_v50 = vrot.slane %v1140_v38, %v3485_v28 }
 0x12f   : > { %2409 = vrot.lane.b32.xlu1 %v3500_v45, %s3226_s12  ;;  %4795 = sst [smem:[#allocation78_spill]] %s3683_s18 }
 0x130   : > { %4792 = sst [smem:[#allocation75_spill]] %s3669_s1 }
 0x131   : > { %s3687_s1 = sld [smem:[#allocation14 + $0x21]] }
 0x132   : > { %4793 = sst [smem:[#allocation76_spill]] %s3673_s19  ;;  %2407 = vrot.lane.b32.xlu0 %v3495_v41, %s3226_s12  ;;  %v925_v41 = vstv %s3584_s7 }
 0x133   : > { %2483 = vrot.lane.b32.xlu1 %v3518_v54, %s3226_s12  ;;  %s3704_s9 = sld [smem:[#allocation14 + $0x2a]] }
 0x134   : > { %4794 = sst [smem:[#allocation77_spill]] %s3679_s13 }
 0x135   : > { %s3714_s16 = sld [smem:[#allocation14 + $0x45]] }
 0x136   : > { %2481 = vrot.lane.b32.xlu0 %v3523_v55, %s3226_s12  ;;  %s3718_s4 = sld [smem:[#allocation14 + $0x18]] }
 0x137   : > { %s3727_s12 = sld [smem:[#allocation14 + $0x33]] }
 0x138   : > { %s3733_s21 = sld [smem:[#allocation14 + $0x4e]] }
 0x139   : > { %s4800_s10 = sld [smem:[#allocation48_spill]] }
 0x13a   : > { %s4801_s2 = sld [smem:[#allocation49_spill]] }
 0x13b   : > { %4796 = sst [smem:[#allocation79_spill]] %s3714_s16 }
 0x13c   : > { %4797 = sst [smem:[#allocation80_spill]] %s3718_s4 }
 0x13d   : > { %4798 = sst [smem:[#allocation81_spill]] %s3727_s12 }
 0x13e   : > { %4799 = sst [smem:[#allocation82_spill]] %s3733_s21 }
 0x13f   : > { %s3743_s23 = sld [smem:[#allocation14 + $0x7]]  ;;  %v1021_v45 = vstv %s4800_s10 }
 0x140   : > { %s4803_s11 = sld [smem:[#allocation50_spill]]  ;;  %v1043_v46 = vstv %s4801_s2 }
 0x141   : > { %s4804_s20 = sld [smem:[#allocation51_spill]] }
 0x142   : > { %s3751_s3 = sld [smem:[#allocation14 + $0x22]] }
 0x143   : > { %s4806_s26 = sld [smem:[#allocation52_spill]] }
 0x144   : > { %s4807_s24 = sld [smem:[#allocation53_spill]] }
 0x145   : > { %4802 = sst [smem:[#allocation83_spill]] %s3743_s23 }
 0x146   : > { %s4808_s17 = sld [smem:[#allocation54_spill]]  ;;  %v1073_v48 = vstv %s4803_s11 }
 0x147   : > { %s4809_s23 = sld [smem:[#allocation55_spill]]  ;;  %v1095_v49 = vstv %s4804_s20  ;;  %v745_v21 = vpop.permute.xlu1 %744 }
 0x148   : > { %4805 = sst [smem:[#allocation84_spill]] %s3751_s3 }
 0x149   : > { %s3758_s21 = sld [smem:[#allocation14 + $0x3d]]  ;;  %v1117_v54 = vstv %s4806_s26 }
 0x14a   : > { %s4811_s12 = sld [smem:[#allocation56_spill]]  ;;  %v1161_v55 = vstv %s4807_s24 }
 0x14b   : > { %s4812_s4 = sld [smem:[#allocation57_spill]]  ;;  %v747_v8 = vpop.permute.xlu1 %746 }
 0x14c   : > { %s4813_s6 = sld [smem:[#allocation58_spill]]  ;;  %v1183_v56 = vstv %s4808_s17  ;;  %v646_v11 = vpop.permute.xlu0 %645  ;;  %v748_v10 = vsel %vm651_vm0, %v745_v21, %v747_v8  ;;  %v749_v16 = vsel %vm651_vm0, %v747_v8, %v745_v21 }
 0x14d   : > { %s3764_s3 = sld [smem:[#allocation14 + $0x10]]  ;;  %v1205_v57 = vstv %s4809_s23  ;;  %v750_v38 = vmul.f32 %v749_v16, %v3721_v19  ;;  %v751_v5 = vmul.f32 %v748_v10, %v3724_v20 }
 0x14e   : > { %s3774_s29 = sld [smem:[#allocation14 + $0x2b]] }
 0x14f   : > { %4810 = sst [smem:[#allocation85_spill]] %s3758_s21  ;;  %v753_v8 = vmul.f32 %v752_v23, %v750_v38  ;;  %v754_v21 = vmul.f32 %v752_v23, %v751_v5  ;;  %v775_v16 = vmul.f32 %v774_v24, %v750_v38  ;;  %v776_v7 = vmul.f32 %v774_v24, %v751_v5 }
 0x150   : > { %s4818_s2 = sld [smem:[#allocation62_spill]]  ;;  %v1235_v58 = vstv %s4811_s12  ;;  %v797_v10 = vmul.f32 %v796_v25, %v750_v38  ;;  %v798_v28 = vmul.f32 %v796_v25, %v751_v5  ;;  %v648_v18 = vpop.permute.xlu0 %647 }
 0x151   : > { %s4819_s10 = sld [smem:[#allocation63_spill]]  ;;  %v1257_v59 = vstv %s4812_s4  ;;  %v757_v61 = vcombine.low %v753_v8, %v754_v21  ;;  %v779_v62 = vcombine.low %v775_v16, %v776_v7  ;;  %v652_v23 = vsel %vm651_vm0, %v646_v11, %v648_v18  ;;  %v832_v38 = vpop.permute.xlu1 %831 }
 0x152   : > { %s3780_s11 = sld [smem:[#allocation14 + $0x46]]  ;;  %v1279_v60 = vstv %s4813_s6  ;;  %v653_v24 = vsel %vm651_vm0, %v648_v18, %v646_v11  ;;  %v801_v25 = vcombine.low %v797_v10, %v798_v28  ;;  %v666_v8 = vmul.f32 %v3724_v20, %v652_v23 }
 0x153   : > { %4815 = sst [smem:[#allocation86_spill]] %s3764_s3  ;;  %v665_v5 = vmul.f32 %v3721_v19, %v653_v24  ;;  %v764_v21 = vrot.slane %v757_v61, %v3707_v12  ;;  %v786_v16 = vrot.slane %v779_v62, %v3707_v12 }
 0x154   : > { %s4820_s20 = sld [smem:[#allocation64_spill]]  ;;  %v808_v11 = vrot.slane %v801_v25, %v3707_v12  ;;  %v669_v28 = vmul.f32 %v667_v26, %v666_v8  ;;  %v830_v23 = vpop.permute.xlu0 %829  ;;  %v691_v61 = vmul.f32 %v689_v27, %v666_v8 }
 0x155   : > { %s3786_s3 = sld [smem:[#allocation14 + $0x19]]  ;;  %v668_v10 = vmul.f32 %v667_v26, %v665_v5  ;;  %v690_v24 = vmul.f32 %v689_v27, %v665_v5  ;;  %v771_v31 = vrot.slane %v764_v21, %v3707_v12  ;;  %v793_v7 = vrot.slane %v786_v16, %v3707_v12  ;;  %v908_v18 = vpop.permute.xlu1 %907 }
 0x156   : > { %s3797_s6 = sld [smem:[#allocation14 + $0x34]]  ;;  %v712_v62 = vmul.f32 %v711_v29, %v665_v5  ;;  %v815_v25 = vrot.slane %v808_v11, %v3707_v12  ;;  %v713_v26 = vmul.f32 %v711_v29, %v666_v8  ;;  %v833_v63 = vsel %vm651_vm0, %v830_v23, %v832_v38 }
 0x157   : > { %s4826_s5 = sld [smem:[#allocation71_spill]]  ;;  %v672_v14 = vcombine.low %v668_v10, %v669_v28  ;;  %v694_v21 = vcombine.low %v690_v24, %v691_v61  ;;  %v834_v16 = vsel %vm651_vm0, %v832_v38, %v830_v23  ;;  %v836_v27 = vmul.f32 %v833_v63, %v3724_v20 }
 0x158   : > { %s3803_s12 = sld [smem:[#allocation14 + $0x4f]]  ;;  %v716_v11 = vcombine.low %v712_v62, %v713_v26  ;;  %v835_v10 = vmul.f32 %v834_v16, %v3721_v19  ;;  %v906_v28 = vpop.permute.xlu0 %905 }
 0x159   : > { %s4828_s22 = sld [smem:[#allocation74_spill]]  ;;  %v679_v3 = vrot.slane %v672_v14, %v3707_v12  ;;  %v701_v8 = vrot.slane %v694_v21, %v3707_v12  ;;  %v839_v24 = vmul.f32 %v837_v36, %v836_v27  ;;  %v861_v61 = vmul.f32 %v859_v37, %v836_v27  ;;  %v994_v23 = vpop.permute.xlu1 %993 }
 0x15a   : > { %s3809_s24 = sld [smem:[#allocation14 + $0x8]]  ;;  %v883_v38 = vmul.f32 %v881_v40, %v836_v27  ;;  %v723_v63 = vrot.slane %v716_v11, %v3707_v12  ;;  %v838_v14 = vmul.f32 %v837_v36, %v835_v10  ;;  %v860_v62 = vmul.f32 %v859_v37, %v835_v10 }
 0x15b   : > { %s3819_s27 = sld [smem:[#allocation14 + $0x23]]  ;;  %v686_v20 = vrot.slane %v679_v3, %v3707_v12  ;;  %v708_v19 = vrot.slane %v701_v8, %v3707_v12  ;;  %v882_v26 = vmul.f32 %v881_v40, %v835_v10  ;;  %v910_v21 = vsel %vm909_vm1, %v906_v28, %v908_v18 }
 0x15c   : > { %s3825_s17 = sld [smem:[#allocation14 + $0x3e]]  ;;  %v911_v16 = vsel %vm909_vm1, %v908_v18, %v906_v28  ;;  %v730_v3 = vrot.slane %v723_v63, %v3707_v12  ;;  %v842_v11 = vcombine.low %v838_v14, %v839_v24  ;;  %v864_v36 = vcombine.low %v860_v62, %v861_v61  ;;  %v992_v29 = vpop.permute.xlu0 %991 }
 0x15d   : > { %s3831_s28 = sld [smem:[#allocation14 + $0x11]]  ;;  %v688_v27 = vadd.f32 %v686_v20, %v3745_v33  ;;  %v710_v37 = vadd.f32 %v708_v19, %v3747_v35  ;;  %v886_v8 = vcombine.low %v882_v26, %v883_v38  ;;  %v923_v40 = vmul.f32 %v3738_v30, %v911_v16  ;;  %v1068_v5 = vpop.permute.xlu1 %1067 }
 0x15e   : > { %s4834_s15 = sld [smem:[#allocation83_spill]]  ;;  %v924_v10 = vmul.f32 %v3741_v32, %v910_v21  ;;  %v732_v18 = vadd.f32 %v730_v3, %v3753_v39  ;;  %v849_v28 = vrot.slane %v842_v11, %v3707_v12  ;;  %v871_v24 = vrot.slane %v864_v36, %v3707_v12 }
 0x15f   : > { %s4835_s25 = sld [smem:[#allocation84_spill]]  ;;  %v773_v33 = vadd.f32 %v771_v31, %v688_v27  ;;  %v795_v61 = vadd.f32 %v793_v7, %v710_v37  ;;  %v893_v20 = vrot.slane %v886_v8, %v3707_v12  ;;  %v926_v35 = vmul.f32 %v925_v41, %v923_v40 }
 0x160   : > { %s3841_s23 = sld [smem:[#allocation14 + $0x2c]]  ;;  %v927_v38 = vmul.f32 %v925_v41, %v924_v10  ;;  %v817_v63 = vadd.f32 %v815_v25, %v732_v18  ;;  %v856_v14 = vrot.slane %v849_v28, %v3707_v12  ;;  %v878_v62 = vrot.slane %v871_v24, %v3707_v12  ;;  %v1066_v31 = vpop.permute.xlu0 %1065 }
 0x161   : > { %s4836_s13 = sld [smem:[#allocation86_spill]]  ;;  %v948_v39 = vmul.f32 %v947_v42, %v923_v40  ;;  %v900_v19 = vrot.slane %v893_v20, %v3707_v12  ;;  %v949_v7 = vmul.f32 %v947_v42, %v924_v10  ;;  %v970_v21 = vmul.f32 %v969_v43, %v923_v40  ;;  %v1144_v16 = vpop.permute.xlu1 %1143 }
 0x162   : > { %s3847_s19 = sld [smem:[#allocation14 + $0x47]]  ;;  %v930_v26 = vcombine.low %v926_v35, %v927_v38  ;;  %v858_v27 = vadd.f32 %v856_v14, %v773_v33  ;;  %v880_v41 = vadd.f32 %v878_v62, %v795_v61  ;;  %v971_v25 = vmul.f32 %v969_v43, %v924_v10 }
 0x163   : > { %4833 = sst [smem:[#allocation62_spill]] %s3831_s28  ;;  %v995_v3 = vsel %vm909_vm1, %v992_v29, %v994_v23  ;;  %v902_v11 = vadd.f32 %v900_v19, %v817_v63  ;;  %v952_v37 = vcombine.low %v948_v39, %v949_v7  ;;  %v996_v42 = vsel %vm909_vm1, %v994_v23, %v992_v29 }
 0x164   : > { %s3855_s18 = sld [smem:[#allocation14 + $0x1a]]  ;;  %v937_v36 = vrot.slane %v930_v26, %v3707_v12  ;;  %v974_v8 = vcombine.low %v970_v21, %v971_v25  ;;  %v997_v40 = vmul.f32 %v996_v42, %v3738_v30  ;;  %v998_v43 = vmul.f32 %v995_v3, %v3741_v32  ;;  %v1142_v18 = vpop.permute.xlu0 %1141 }
 0x165   : > { %s3863_s16 = sld [smem:[#allocation14 + $0x35]]  ;;  %v1069_v10 = vsel %vm909_vm1, %v1066_v31, %v1068_v5  ;;  %v959_v28 = vrot.slane %v952_v37, %v3707_v12  ;;  %v1070_v24 = vsel %vm909_vm1, %v1068_v5, %v1066_v31  ;;  %v4003_v23 = vpop.permute.xlu1 %1229 }
 0x166   : > { %s3869_s4 = sld [smem:[#allocation14 + $0x50]]  ;;  %v944_v33 = vrot.slane %v937_v36, %v3707_v12  ;;  %v1072_v29 = vmul.f32 %v1069_v10, %v3741_v32  ;;  %v981_v61 = vrot.slane %v974_v8, %v3707_v12  ;;  %v1000_v20 = vmul.f32 %v999_v44, %v997_v40 }
 0x167   : > { %s3908_s26 = sld [smem:[#allocation15]]  ;;  %v1001_v35 = vmul.f32 %v999_v44, %v998_v43  ;;  %v1022_v38 = vmul.f32 %v1021_v45, %v997_v40  ;;  %v966_v14 = vrot.slane %v959_v28, %v3707_v12  ;;  %v1023_v5 = vmul.f32 %v1021_v45, %v998_v43 }
 0x168   : > { %4837 = sst [smem:[#allocation63_spill]] %s3847_s19  ;;  %v946_v63 = vadd.f32 %v944_v33, %v858_v27  ;;  %v1044_v32 = vmul.f32 %v1043_v46, %v997_v40  ;;  %v988_v62 = vrot.slane %v981_v61, %v3707_v12  ;;  %v1045_v31 = vmul.f32 %v1043_v46, %v998_v43  ;;  %v1228_v19 = vpop.permute.xlu0 %1227 }
 0x169   : > { %s3912_s19 = sld [smem:[#allocation15 + $0x1]]  ;;  %v1004_v39 = vcombine.low %v1000_v20, %v1001_v35  ;;  %v1071_v44 = vmul.f32 %v1070_v24, %v3738_v30  ;;  %v968_v26 = vadd.f32 %v966_v14, %v880_v41  ;;  %v1026_v7 = vcombine.low %v1022_v38, %v1023_v5  ;;  %v1304_v37 = vpop.permute.xlu1 %1303 }
 0x16a   : > { %v1075_v21 = vmul.f32 %v1073_v48, %v1072_v29  ;;  %v1097_v27 = vmul.f32 %v1095_v49, %v1072_v29  ;;  %v990_v45 = vadd.f32 %v988_v62, %v902_v11  ;;  %v1048_v3 = vcombine.low %v1044_v32, %v1045_v31  ;;  %s4865_s21 = sld [smem:[#allocation59_spill]] }
 0x16b   : > { %4838 = sst [smem:[#allocation64_spill]] %s3863_s16  ;;  %v1011_v25 = vrot.slane %v1004_v39, %v3707_v12  ;;  %v1074_v36 = vmul.f32 %v1073_v48, %v1071_v44  ;;  %v1033_v42 = vrot.slane %v1026_v7, %v3707_v12  ;;  %v1096_v46 = vmul.f32 %v1095_v49, %v1071_v44 }
 0x16c   : > { %4840 = sst [smem:[#allocation71_spill]] %s3869_s4  ;;  %v1118_v30 = vmul.f32 %v1117_v54, %v1071_v44  ;;  %v1119_v41 = vmul.f32 %v1117_v54, %v1072_v29  ;;  %v1055_v40 = vrot.slane %v1048_v3, %v3707_v12  ;;  %v1146_v11 = vsel %vm1145_vm2, %v1142_v18, %v1144_v16  ;;  %v1302_v10 = vpop.permute.xlu0 %1301 }
 0x16d   : > { %v1018_v8 = vrot.slane %v1011_v25, %v3707_v12  ;;  %v1078_v43 = vcombine.low %v1074_v36, %v1075_v21  ;;  %v1040_v48 = vrot.slane %v1033_v42, %v3707_v12  ;;  %v1100_v33 = vcombine.low %v1096_v46, %v1097_v27  ;;  %v4053_v32 = vpop.permute.xlu1 %1379  ;;  %s4866_s28 = sld [smem:[#allocation60_spill]] }
 0x16e   : > { %v1122_v28 = vcombine.low %v1118_v30, %v1119_v41  ;;  %v1147_v49 = vsel %vm1145_vm2, %v1144_v16, %v1142_v18  ;;  %v1062_v54 = vrot.slane %v1055_v40, %v3707_v12  ;;  %v1160_v14 = vmul.f32 %v3772_v51, %v1146_v11  ;;  %s4880_s7 = sld [smem:[#allocation65_spill]] }
 0x16f   : > { %4846 = sst [smem:[#allocation74_spill]] %s3912_s19  ;;  %v1020_v24 = vadd.f32 %v1018_v8, %v946_v63  ;;  %v1085_v29 = vrot.slane %v1078_v43, %v3707_v12  ;;  %v1159_v61 = vmul.f32 %v3769_v50, %v1147_v49  ;;  %v1042_v20 = vadd.f32 %v1040_v48, %v968_v26 }
 0x170   : > { %v1107_v35 = vrot.slane %v1100_v33, %v3707_v12  ;;  %v1129_v38 = vrot.slane %v1122_v28, %v3707_v12  ;;  %v1064_v5 = vadd.f32 %v1062_v54, %v990_v45  ;;  %v1378_v62 = vpop.permute.xlu0 %1377  ;;  %v1163_v44 = vmul.f32 %v1161_v55, %v1160_v14  ;;  %s4867_s19 = sld [smem:[#allocation61_spill]] }
 0x171   : > { %v1092_v16 = vrot.slane %v1085_v29, %v3707_v12  ;;  %v1162_v18 = vmul.f32 %v1161_v55, %v1159_v61  ;;  %v1184_v63 = vmul.f32 %v1183_v56, %v1159_v61  ;;  %v1185_v26 = vmul.f32 %v1183_v56, %v1160_v14  ;;  %v1466_v48 = vpop.permute.xlu1 %1465  ;;  %s4897_s16 = sld [smem:[#allocation70_spill]] }
 0x172   : > { %v1114_v39 = vrot.slane %v1107_v35, %v3707_v12  ;;  %v1136_v31 = vrot.slane %v1129_v38, %v3707_v12  ;;  %v1206_v21 = vmul.f32 %v1205_v57, %v1159_v61  ;;  %v1207_v27 = vmul.f32 %v1205_v57, %v1160_v14  ;;  %s4902_s4 = sld [smem:[#allocation72_spill]] }
 0x173   : > { %v1094_v7 = vadd.f32 %v1092_v16, %v1020_v24  ;;  %v1231_v45 = vsel %vm1145_vm2, %v1228_v19, %v4003_v23  ;;  %v1166_v36 = vcombine.low %v1162_v18, %v1163_v44  ;;  %v1188_v55 = vcombine.low %v1184_v63, %v1185_v26 }
 0x174   : > { %v1116_v25 = vadd.f32 %v1114_v39, %v1042_v20  ;;  %v1138_v3 = vadd.f32 %v1136_v31, %v1064_v5  ;;  %v1210_v42 = vcombine.low %v1206_v21, %v1207_v27  ;;  %v1232_v56 = vsel %vm1145_vm2, %v4003_v23, %v1228_v19  ;;  %v1464_v33 = vpop.permute.xlu0 %1463 }
 0x175   : > { %v1234_v57 = vmul.f32 %v1231_v45, %v3772_v51  ;;  %v1305_v46 = vsel %vm1145_vm2, %v1302_v10, %v1304_v37  ;;  %v1173_v30 = vrot.slane %v1166_v36, %v3707_v12  ;;  %v1195_v41 = vrot.slane %v1188_v55, %v3707_v12 }
 0x176   : > { %v1233_v8 = vmul.f32 %v1232_v56, %v3769_v50  ;;  %v1306_v40 = vsel %vm1145_vm2, %v1304_v37, %v1302_v10  ;;  %v1217_v43 = vrot.slane %v1210_v42, %v3707_v12  ;;  %v1308_v61 = vmul.f32 %v1305_v46, %v3772_v51 }
 0x177   : > { %v1237_v23 = vmul.f32 %v1235_v58, %v1234_v57  ;;  %v1259_v19 = vmul.f32 %v1257_v59, %v1234_v57  ;;  %v1281_v11 = vmul.f32 %v1279_v60, %v1234_v57  ;;  %v1180_v28 = vrot.slane %v1173_v30, %v3707_v12 }
 0x178   : > { %v1202_v49 = vrot.slane %v1195_v41, %v3707_v12  ;;  %v1236_v24 = vmul.f32 %v1235_v58, %v1233_v8  ;;  %v1258_v37 = vmul.f32 %v1257_v59, %v1233_v8  ;;  %v1224_v10 = vrot.slane %v1217_v43, %v3707_v12  ;;  %v1538_v36 = vpop.permute.xlu0 %1537 }
 0x179   : > { %v1280_v54 = vmul.f32 %v1279_v60, %v1233_v8  ;;  %v1307_v29 = vmul.f32 %v1306_v40, %v3769_v50  ;;  %v1182_v20 = vadd.f32 %v1180_v28, %v1094_v7  ;;  %v4868_v16 = vstv %s4865_s21  ;;  %s4904_s21 = sld [smem:[#allocation73_spill]] }
 0x17a   : > { %v1204_v35 = vadd.f32 %v1202_v49, %v1116_v25  ;;  %v1240_v38 = vcombine.low %v1236_v24, %v1237_v23  ;;  %v1262_v14 = vcombine.low %v1258_v37, %v1259_v19  ;;  %v1226_v5 = vadd.f32 %v1224_v10, %v1138_v3  ;;  %v1540_v3 = vpop.permute.xlu1 %1539 }
 0x17b   : > { %v1284_v58 = vcombine.low %v1280_v54, %v1281_v11  ;;  %v1310_v18 = vmul.f32 %v4868_v16, %v1307_v29  ;;  %v4869_v59 = vmov %v4868_v16  ;;  %v4870_v31 = vstv %s4866_s28  ;;  %s4914_s28 = sld [smem:[#allocation77_spill]] }
 0x17c   : > { %v1311_v63 = vmul.f32 %v4869_v59, %v1308_v61  ;;  %v1247_v39 = vrot.slane %v1240_v38, %v3707_v12  ;;  %v1269_v60 = vrot.slane %v1262_v14, %v3707_v12  ;;  %v1332_v50 = vmul.f32 %v4870_v31, %v1307_v29 }
 0x17d   : > { %v4871_v44 = vmov %v4870_v31  ;;  %v1291_v51 = vrot.slane %v1284_v58, %v3707_v12  ;;  %v4872_v21 = vstv %s4867_s19  ;;  %v1382_v57 = vsel %vm1381_vm3, %v1378_v62, %v4053_v32  ;;  %s4928_s19 = sld [smem:[#allocation79_spill]] }
 0x17e   : > { %v1333_v26 = vmul.f32 %v4871_v44, %v1308_v61  ;;  %v1314_v7 = vcombine.low %v1310_v18, %v1311_v63  ;;  %v1354_v27 = vmul.f32 %v4872_v21, %v1307_v29  ;;  %v4873_v45 = vmov %v4872_v21  ;;  %v1616_v16 = vpop.permute.xlu1 %1615  ;;  %v1614_v18 = vpop.permute.xlu0 %1613 }
 0x17f   : > { %v1355_v25 = vmul.f32 %v4873_v45, %v1308_v61  ;;  %v1254_v55 = vrot.slane %v1247_v39, %v3707_v12  ;;  %v1276_v42 = vrot.slane %v1269_v60, %v3707_v12  ;;  %v1298_v46 = vrot.slane %v1291_v51, %v3707_v12 }
 0x180   : > { %v1336_v56 = vcombine.low %v1332_v50, %v1333_v26  ;;  %v1321_v30 = vrot.slane %v1314_v7, %v3707_v12  ;;  %v1383_v8 = vsel %vm1381_vm3, %v4053_v32, %v1378_v62  ;;  %v1396_v24 = vmul.f32 %v3795_v1, %v1382_v57 }
 0x181   : > { %v1358_v41 = vcombine.low %v1354_v27, %v1355_v25  ;;  %v1256_v40 = vadd.f32 %v1254_v55, %v1182_v20  ;;  %v1278_v43 = vadd.f32 %v1276_v42, %v1204_v35  ;;  %v1395_v19 = vmul.f32 %v3792_v0, %v1383_v8 }
 0x182   : > { %v1343_v23 = vrot.slane %v1336_v56, %v3707_v12  ;;  %v1300_v11 = vadd.f32 %v1298_v46, %v1226_v5  ;;  %v1328_v28 = vrot.slane %v1321_v30, %v3707_v12  ;;  %v4874_v10 = vstv %s3630_s30  ;;  %s4881_s30 = sld [smem:[#allocation66_spill]] }
 0x183   : > { %v1365_v49 = vrot.slane %v1358_v41, %v3707_v12  ;;  %v1398_v54 = vmul.f32 %v4874_v10, %v1395_v19  ;;  %v4875_v32 = vstv %s4818_s2  ;;  %v4876_v29 = vstv %s4819_s10  ;;  %s4886_s10 = sld [smem:[#allocation67_spill]] }
 0x184   : > { %v1350_v37 = vrot.slane %v1343_v23, %v3707_v12  ;;  %v1420_v62 = vmul.f32 %v4875_v32, %v1395_v19  ;;  %v1442_v61 = vmul.f32 %v4876_v29, %v1395_v19  ;;  %v1330_v20 = vadd.f32 %v1328_v28, %v1256_v40  ;;  %s4889_s2 = sld [smem:[#allocation68_spill]]  ;;  %v1702_v28 = vpop.permute.xlu1 %1701 }
 0x185   : > { %v1372_v35 = vrot.slane %v1365_v49, %v3707_v12  ;;  %v4877_v38 = vmov %v4874_v10  ;;  %v4878_v5 = vmov %v4875_v32  ;;  %v4879_v63 = vmov %v4876_v29  ;;  %v1700_v49 = vpop.permute.xlu0 %1699 }
 0x186   : > { %v1399_v14 = vmul.f32 %v4877_v38, %v1396_v24  ;;  %v1421_v58 = vmul.f32 %v4878_v5, %v1396_v24  ;;  %v1352_v59 = vadd.f32 %v1350_v37, %v1278_v43  ;;  %v1443_v39 = vmul.f32 %v4879_v63, %v1396_v24 }
 0x187   : > { %v1467_v60 = vsel %vm1381_vm3, %v1464_v33, %v1466_v48  ;;  %v1468_v31 = vsel %vm1381_vm3, %v1466_v48, %v1464_v33  ;;  %v1374_v50 = vadd.f32 %v1372_v35, %v1300_v11  ;;  %v1541_v27 = vsel %vm1381_vm3, %v1538_v36, %v1540_v3 }
 0x188   : > { %v1402_v44 = vcombine.low %v1398_v54, %v1399_v14  ;;  %v1424_v26 = vcombine.low %v1420_v62, %v1421_v58  ;;  %v1469_v51 = vmul.f32 %v1468_v31, %v3792_v0  ;;  %v1446_v7 = vcombine.low %v1442_v61, %v1443_v39 }
 0x189   : > { %v1470_v21 = vmul.f32 %v1467_v60, %v3795_v1  ;;  %v1542_v45 = vsel %vm1381_vm3, %v1540_v3, %v1538_v36  ;;  %v4882_v25 = vstv %s4820_s20  ;;  %v4883_v42 = vstv %s4880_s7  ;;  %s4890_s20 = sld [smem:[#allocation69_spill]] }
 0x18a   : > { %v1409_v48 = vrot.slane %v1402_v44, %v3707_v12  ;;  %v1431_v33 = vrot.slane %v1424_v26, %v3707_v12  ;;  %v1472_v55 = vmul.f32 %v4882_v25, %v1469_v51  ;;  %v1494_v56 = vmul.f32 %v4883_v42, %v1469_v51  ;;  %s4486_s7 = sld [smem:[#allocation12 + $0x1]] }
 0x18b   : > { %v1453_v57 = vrot.slane %v1446_v7, %v3707_v12  ;;  %v4884_v46 = vmov %v4882_v25  ;;  %v4885_v41 = vmov %v4883_v42  ;;  %v4887_v40 = vstv %s4881_s30  ;;  %v1774_v25 = vpop.permute.xlu0 %1773  ;;  %s4496_s30 = sld [smem:[#allocation11 + $0x6]] }
 0x18c   : > { %v1473_v30 = vmul.f32 %v4884_v46, %v1470_v21  ;;  %v1495_v8 = vmul.f32 %v4885_v41, %v1470_v21  ;;  %v1516_v43 = vmul.f32 %v4887_v40, %v1469_v51  ;;  %v1416_v23 = vrot.slane %v1409_v48, %v3707_v12 }
 0x18d   : > { %v1438_v3 = vrot.slane %v1431_v33, %v3707_v12  ;;  %v4888_v36 = vmov %v4887_v40  ;;  %v1543_v11 = vmul.f32 %v1542_v45, %v3792_v0  ;;  %v1460_v24 = vrot.slane %v1453_v57, %v3707_v12  ;;  %v1776_v33 = vpop.permute.xlu1 %1775 }
 0x18e   : > { %v1517_v19 = vmul.f32 %v4888_v36, %v1470_v21  ;;  %v1476_v37 = vcombine.low %v1472_v55, %v1473_v30  ;;  %v1498_v10 = vcombine.low %v1494_v56, %v1495_v8  ;;  %v1544_v54 = vmul.f32 %v1541_v27, %v3795_v1 }
 0x18f   : > { %v1418_v32 = vadd.f32 %v1416_v23, %v1330_v20  ;;  %v1440_v62 = vadd.f32 %v1438_v3, %v1352_v59  ;;  %v4891_v61 = vstv %s4886_s10  ;;  %v1462_v38 = vadd.f32 %v1460_v24, %v1374_v50  ;;  %s4984_s10 = sld [smem:[#allocation34_spill]] }
 0x190   : > { %v1520_v29 = vcombine.low %v1516_v43, %v1517_v19  ;;  %v1546_v35 = vmul.f32 %v4891_v61, %v1543_v11  ;;  %v1483_v0 = vrot.slane %v1476_v37, %v3707_v12  ;;  %v1505_v14 = vrot.slane %v1498_v10, %v3707_v12 }
 0x191   : > { %v4892_v5 = vmov %v4891_v61  ;;  %v4893_v39 = vstv %s4889_s2  ;;  %v4895_v1 = vstv %s4890_s20  ;;  %v1618_v45 = vsel %vm1617_vm4, %v1614_v18, %v1616_v16  ;;  %s4503_s2 = sld [smem:[#allocation11 + $0x7]] }
 0x192   : > { %v1547_v58 = vmul.f32 %v4892_v5, %v1544_v54  ;;  %v1527_v63 = vrot.slane %v1520_v29, %v3707_v12  ;;  %v1568_v60 = vmul.f32 %v4893_v39, %v1543_v11  ;;  %v4894_v31 = vmov %v4893_v39  ;;  %v1850_v5 = vpop.permute.xlu0 %1849 }
 0x193   : > { %v1569_v44 = vmul.f32 %v4894_v31, %v1544_v54  ;;  %v1590_v26 = vmul.f32 %v4895_v1, %v1543_v11  ;;  %v1490_v20 = vrot.slane %v1483_v0, %v3707_v12  ;;  %v1512_v59 = vrot.slane %v1505_v14, %v3707_v12  ;;  %v1852_v14 = vpop.permute.xlu1 %1851 }
 0x194   : > { %v1550_v51 = vcombine.low %v1546_v35, %v1547_v58  ;;  %v4896_v50 = vmov %v4895_v1  ;;  %v1534_v21 = vrot.slane %v1527_v63, %v3707_v12  ;;  %v1619_v48 = vsel %vm1617_vm4, %v1616_v16, %v1614_v18 }
 0x195   : > { %v1591_v7 = vmul.f32 %v4896_v50, %v1544_v54  ;;  %v1572_v27 = vcombine.low %v1568_v60, %v1569_v44  ;;  %v1492_v55 = vadd.f32 %v1490_v20, %v1418_v32  ;;  %v1514_v42 = vadd.f32 %v1512_v59, %v1440_v62  ;;  %s2853_s20 = smul.u32 12, %s4984_s10 }
 0x196   : > { %v1557_v56 = vrot.slane %v1550_v51, %v3707_v12  ;;  %v1536_v46 = vadd.f32 %v1534_v21, %v1462_v38  ;;  %v1631_v41 = vmul.f32 %v3813_v15, %v1618_v45  ;;  %v1632_v8 = vmul.f32 %v3816_v17, %v1619_v48 }
 0x197   : > { %v1594_v57 = vcombine.low %v1590_v26, %v1591_v7  ;;  %v1579_v30 = vrot.slane %v1572_v27, %v3707_v12  ;;  %v1703_v40 = vsel %vm1617_vm4, %v1700_v49, %v1702_v28  ;;  %v1704_v43 = vsel %vm1617_vm4, %v1702_v28, %v1700_v49 }
 0x198   : > { %v1564_v16 = vrot.slane %v1557_v56, %v3707_v12  ;;  %v4898_v3 = vstv %s4897_s16  ;;  %v4900_v24 = vstv %s3654_s8  ;;  %v4903_v29 = vstv %s4826_s5  ;;  %s4912_s5 = sld [smem:[#allocation75_spill]] }
 0x199   : > { %v1601_v18 = vrot.slane %v1594_v57, %v3707_v12  ;;  %v1586_v23 = vrot.slane %v1579_v30, %v3707_v12  ;;  %v1634_v36 = vmul.f32 %v4898_v3, %v1631_v41  ;;  %v4899_v19 = vmov %v4898_v3  ;;  %s4913_s8 = sld [smem:[#allocation76_spill]]  ;;  %v1938_v3 = vpop.permute.xlu1 %1937 }
 0x19a   : > { %v1635_v11 = vmul.f32 %v4899_v19, %v1632_v8  ;;  %v1656_v37 = vmul.f32 %v4900_v24, %v1631_v41  ;;  %v1566_v10 = vadd.f32 %v1564_v16, %v1492_v55  ;;  %v4901_v32 = vmov %v4900_v24  ;;  %s4526_s16 = sld [smem:[#allocation12 + $0x2]] }
 0x19b   : > { %v1608_v54 = vrot.slane %v1601_v18, %v3707_v12  ;;  %v1657_v62 = vmul.f32 %v4901_v32, %v1632_v8  ;;  %v1678_v61 = vmul.f32 %v4903_v29, %v1631_v41  ;;  %v1588_v28 = vadd.f32 %v1586_v23, %v1514_v42 }
 0x19c   : > { %v1638_v49 = vcombine.low %v1634_v36, %v1635_v11  ;;  %v4905_v35 = vmov %v4903_v29  ;;  %v1705_v0 = vmul.f32 %v1703_v40, %v3813_v15  ;;  %v1706_v39 = vmul.f32 %v1704_v43, %v3816_v17  ;;  %v1936_v36 = vpop.permute.xlu0 %1935 }
 0x19d   : > { %v1679_v38 = vmul.f32 %v4905_v35, %v1632_v8  ;;  %v1610_v58 = vadd.f32 %v1608_v54, %v1536_v46  ;;  %v1660_v63 = vcombine.low %v1656_v37, %v1657_v62  ;;  %v1777_v60 = vsel %vm1617_vm4, %v1774_v25, %v1776_v33 }
 0x19e   : > { %v1645_v31 = vrot.slane %v1638_v49, %v3707_v12  ;;  %v4906_v1 = vstv %s4902_s4  ;;  %v4907_v20 = vstv %s4904_s21  ;;  %v4910_v45 = vstv %s4828_s22  ;;  %s4921_s22 = sld [smem:[#allocation78_spill]] }
 0x19f   : > { %v1682_v44 = vcombine.low %v1678_v61, %v1679_v38  ;;  %v1708_v26 = vmul.f32 %v4906_v1, %v1705_v0  ;;  %v1730_v59 = vmul.f32 %v4907_v20, %v1705_v0  ;;  %v1667_v51 = vrot.slane %v1660_v63, %v3707_v12  ;;  %s4989_s4 = sld [smem:[#allocation74_spill]] }
 0x1a0   : > { %v4908_v50 = vmov %v4906_v1  ;;  %v4909_v21 = vmov %v4907_v20  ;;  %v1752_v48 = vmul.f32 %v4910_v45, %v1705_v0  ;;  %v1652_v55 = vrot.slane %v1645_v31, %v3707_v12  ;;  %s4992_s21 = sld [smem:[#allocation29_spill]] }
 0x1a1   : > { %v1709_v7 = vmul.f32 %v4908_v50, %v1706_v39  ;;  %v1731_v27 = vmul.f32 %v4909_v21, %v1706_v39  ;;  %v1689_v42 = vrot.slane %v1682_v44, %v3707_v12  ;;  %v4911_v56 = vmov %v4910_v45  ;;  %v2012_v50 = vpop.permute.xlu1 %2011 }
 0x1a2   : > { %v1753_v57 = vmul.f32 %v4911_v56, %v1706_v39  ;;  %v1778_v46 = vsel %vm1617_vm4, %v1776_v33, %v1774_v25  ;;  %v1674_v30 = vrot.slane %v1667_v51, %v3707_v12  ;;  %v1779_v16 = vmul.f32 %v1777_v60, %v3813_v15 }
 0x1a3   : > { %v1712_v41 = vcombine.low %v1708_v26, %v1709_v7  ;;  %v1734_v8 = vcombine.low %v1730_v59, %v1731_v27  ;;  %v1654_v18 = vadd.f32 %v1652_v55, %v1566_v10  ;;  %v1696_v40 = vrot.slane %v1689_v42, %v3707_v12  ;;  %v2010_v7 = vpop.permute.xlu0 %2009 }
 0x1a4   : > { %v1756_v43 = vcombine.low %v1752_v48, %v1753_v57  ;;  %v1780_v23 = vmul.f32 %v1778_v46, %v3816_v17  ;;  %v1676_v33 = vadd.f32 %v1674_v30, %v1588_v28  ;;  %v4915_v11 = vstv %s4912_s5  ;;  %s411_s5 = scalar_lea.vmem [#allocation17], %s2853_s20 }
 0x1a5   : > { %v1719_v25 = vrot.slane %v1712_v41, %v3707_v12  ;;  %v1741_v19 = vrot.slane %v1734_v8, %v3707_v12  ;;  %v1782_v24 = vmul.f32 %v4915_v11, %v1779_v16  ;;  %v1698_v37 = vadd.f32 %v1696_v40, %v1610_v58 }
 0x1a6   : > { %v1763_v15 = vrot.slane %v1756_v43, %v3707_v12  ;;  %v4916_v10 = vmov %v4915_v11  ;;  %v4917_v32 = vstv %s4913_s8  ;;  %v4919_v28 = vstv %s4914_s28  ;;  %s2854_s8 = smul.u32 192, %s4992_s21  ;;  %s2582_s28 = sshll.u32 %s411_s5, 4  ;;  %s2583_s28 = int_to_ptr.vmem [resolvable:$true] %s2582_s28 }
 0x1a7   : > { %v1783_v54 = vmul.f32 %v4916_v10, %v1780_v23  ;;  %v1804_v62 = vmul.f32 %v4917_v32, %v1779_v16  ;;  %v1726_v29 = vrot.slane %v1719_v25, %v3707_v12  ;;  %v1748_v17 = vrot.slane %v1741_v19, %v3707_v12 }
 0x1a8   : > { %v4918_v61 = vmov %v4917_v32  ;;  %v1826_v35 = vmul.f32 %v4919_v28, %v1779_v16  ;;  %v1770_v38 = vrot.slane %v1763_v15, %v3707_v12  ;;  %v4920_v63 = vmov %v4919_v28 }
 0x1a9   : > { %v1805_v49 = vmul.f32 %v4918_v61, %v1780_v23  ;;  %v1786_v0 = vcombine.low %v1782_v24, %v1783_v54  ;;  %v1827_v39 = vmul.f32 %v4920_v63, %v1780_v23  ;;  %v1854_v58 = vsel %vm1853_vm5, %v1850_v5, %v1852_v14 }
 0x1aa   : > { %v1728_v60 = vadd.f32 %v1726_v29, %v1654_v18  ;;  %v1750_v31 = vadd.f32 %v1748_v17, %v1676_v33  ;;  %v1855_v1 = vsel %vm1853_vm5, %v1852_v14, %v1850_v5  ;;  %v1772_v26 = vadd.f32 %v1770_v38, %v1698_v37  ;;  %v2088_v29 = vpop.permute.xlu1 %2087  ;;  %v2086_v17 = vpop.permute.xlu0 %2085 }
 0x1ab   : > { %v1808_v44 = vcombine.low %v1804_v62, %v1805_v49  ;;  %v1793_v20 = vrot.slane %v1786_v0, %v3707_v12  ;;  %v1830_v59 = vcombine.low %v1826_v35, %v1827_v39  ;;  %v1867_v51 = vmul.f32 %v3834_v22, %v1854_v58 }
 0x1ac   : > { %v1868_v27 = vmul.f32 %v3837_v52, %v1855_v1  ;;  %v1939_v45 = vsel %vm1853_vm5, %v1936_v36, %v1938_v3  ;;  %v1940_v14 = vsel %vm1853_vm5, %v1938_v3, %v1936_v36  ;;  %v4922_v55 = vstv %s4921_s22 }
 0x1ad   : > { %v1815_v21 = vrot.slane %v1808_v44, %v3707_v12  ;;  %v1800_v5 = vrot.slane %v1793_v20, %v3707_v12  ;;  %v1837_v48 = vrot.slane %v1830_v59, %v3707_v12  ;;  %v1870_v42 = vmul.f32 %v4922_v55, %v1867_v51 }
 0x1ae   : > { %v4923_v56 = vstv %s3687_s1  ;;  %v4924_v30 = vmov %v4922_v55  ;;  %v4926_v18 = vstv %s3695_s0  ;;  %v1941_v33 = vmul.f32 %v1939_v45, %v3834_v22  ;;  %s4935_s1 = sld [smem:[#allocation80_spill]] }
 0x1af   : > { %v1892_v57 = vmul.f32 %v4923_v56, %v1867_v51  ;;  %v1822_v46 = vrot.slane %v1815_v21, %v3707_v12  ;;  %v1871_v41 = vmul.f32 %v4924_v30, %v1868_v27  ;;  %v4925_v8 = vmov %v4923_v56  ;;  %s4936_s0 = sld [smem:[#allocation81_spill]] }
 0x1b0   : > { %v1893_v16 = vmul.f32 %v4925_v8, %v1868_v27  ;;  %v1914_v40 = vmul.f32 %v4926_v18, %v1867_v51  ;;  %v1802_v43 = vadd.f32 %v1800_v5, %v1728_v60  ;;  %v1844_v23 = vrot.slane %v1837_v48, %v3707_v12 }
 0x1b1   : > { %v4927_v3 = vmov %v4926_v18  ;;  %v1824_v25 = vadd.f32 %v1822_v46, %v1750_v31  ;;  %v1874_v19 = vcombine.low %v1870_v42, %v1871_v41  ;;  %v1942_v24 = vmul.f32 %v1940_v14, %v3837_v52  ;;  %v2174_v41 = vpop.permute.xlu1 %2173 }
 0x1b2   : > { %v1915_v36 = vmul.f32 %v4927_v3, %v1868_v27  ;;  %v1896_v11 = vcombine.low %v1892_v57, %v1893_v16  ;;  %v1846_v37 = vadd.f32 %v1844_v23, %v1772_v26  ;;  %v4929_v10 = vstv %s3701_s14  ;;  %s4937_s14 = sld [smem:[#allocation82_spill]] }
 0x1b3   : > { %v1944_v54 = vmul.f32 %v4929_v10, %v1941_v33  ;;  %v4930_v32 = vstv %s3704_s9  ;;  %v1881_v61 = vrot.slane %v1874_v19, %v3707_v12  ;;  %v4931_v28 = vmov %v4929_v10  ;;  %s4944_s9 = sld [smem:[#allocation85_spill]] }
 0x1b4   : > { %v1918_v15 = vcombine.low %v1914_v40, %v1915_v36  ;;  %v1966_v62 = vmul.f32 %v4930_v32, %v1941_v33  ;;  %v1903_v49 = vrot.slane %v1896_v11, %v3707_v12  ;;  %v1945_v35 = vmul.f32 %v4931_v28, %v1942_v24 }
 0x1b5   : > { %v4932_v38 = vmov %v4930_v32  ;;  %v4933_v39 = vstv %s4928_s19  ;;  %v2013_v44 = vsel %vm1853_vm5, %v2010_v7, %v2012_v50  ;;  %v1888_v1 = vrot.slane %v1881_v61, %v3707_v12 }
 0x1b6   : > { %v1967_v0 = vmul.f32 %v4932_v38, %v1942_v24  ;;  %v1925_v63 = vrot.slane %v1918_v15, %v3707_v12  ;;  %v1988_v58 = vmul.f32 %v4933_v39, %v1941_v33  ;;  %v4934_v60 = vmov %v4933_v39 }
 0x1b7   : > { %v1989_v31 = vmul.f32 %v4934_v60, %v1942_v24  ;;  %v1910_v26 = vrot.slane %v1903_v49, %v3707_v12  ;;  %v1948_v20 = vcombine.low %v1944_v54, %v1945_v35  ;;  %v2014_v27 = vsel %vm1853_vm5, %v2012_v50, %v2010_v7  ;;  %v2172_v50 = vpop.permute.xlu0 %2171 }
 0x1b8   : > { %v1970_v59 = vcombine.low %v1966_v62, %v1967_v0  ;;  %v1932_v51 = vrot.slane %v1925_v63, %v3707_v12  ;;  %v2015_v45 = vmul.f32 %v2013_v44, %v3834_v22  ;;  %v1890_v14 = vadd.f32 %v1888_v1, %v1802_v43  ;;  %v2248_v0 = vpop.permute.xlu1 %2247 }
 0x1b9   : > { %v1992_v21 = vcombine.low %v1988_v58, %v1989_v31  ;;  %v1912_v5 = vadd.f32 %v1910_v26, %v1824_v25  ;;  %v1955_v48 = vrot.slane %v1948_v20, %v3707_v12  ;;  %v2016_v57 = vmul.f32 %v2014_v27, %v3837_v52 }
 0x1ba   : > { %v1977_v55 = vrot.slane %v1970_v59, %v3707_v12  ;;  %v1934_v42 = vadd.f32 %v1932_v51, %v1846_v37  ;;  %v4938_v46 = vstv %s4935_s1  ;;  %v4939_v8 = vstv %s4936_s0  ;;  %s4994_s1 = sld [smem:[#allocation95_spill]] }
 0x1bb   : > { %v1999_v56 = vrot.slane %v1992_v21, %v3707_v12  ;;  %v2018_v30 = vmul.f32 %v4938_v46, %v2015_v45  ;;  %v1962_v22 = vrot.slane %v1955_v48, %v3707_v12  ;;  %v2040_v16 = vmul.f32 %v4939_v8, %v2015_v45  ;;  %v2246_v63 = vpop.permute.xlu0 %2245 }
 0x1bc   : > { %v1984_v7 = vrot.slane %v1977_v55, %v3707_v12  ;;  %v4940_v18 = vstv %s4937_s14  ;;  %v4941_v23 = vmov %v4938_v46  ;;  %v4942_v36 = vmov %v4939_v8  ;;  %s2568_s14 = scalar_lea.sflag [#allocation4], %s4984_s10 }
 0x1bd   : > { %v2062_v40 = vmul.f32 %v4940_v18, %v2015_v45  ;;  %v2006_v43 = vrot.slane %v1999_v56, %v3707_v12  ;;  %v2019_v3 = vmul.f32 %v4941_v23, %v2016_v57  ;;  %v2041_v33 = vmul.f32 %v4942_v36, %v2016_v57 }
 0x1be   : > { %v4943_v25 = vmov %v4940_v18  ;;  %v1964_v19 = vadd.f32 %v1962_v22, %v1890_v14  ;;  %v1986_v11 = vadd.f32 %v1984_v7, %v1912_v5  ;;  %v2090_v24 = vsel %vm2089_vm6, %v2086_v17, %v2088_v29 }
 0x1bf   : > { %v2063_v52 = vmul.f32 %v4943_v25, %v2016_v57  ;;  %v2091_v37 = vsel %vm2089_vm6, %v2088_v29, %v2086_v17  ;;  %v2008_v15 = vadd.f32 %v2006_v43, %v1934_v42  ;;  %v2022_v10 = vcombine.low %v2018_v30, %v2019_v3 }
 0x1c0   : > { %v2044_v54 = vcombine.low %v2040_v16, %v2041_v33  ;;  %v2103_v62 = vmul.f32 %v3853_v6, %v2090_v24  ;;  %v2104_v61 = vmul.f32 %v3858_v2, %v2091_v37  ;;  %v2175_v49 = vsel %vm2089_vm6, %v2172_v50, %v2174_v41  ;;  %s2580_s0 = scalar_lea.hbm %s4994_s1, %s2854_s8 }
 0x1c1   : > { %v2066_v32 = vcombine.low %v2062_v40, %v2063_v52  ;;  %v2176_v28 = vsel %vm2089_vm6, %v2174_v41, %v2172_v50  ;;  %v2029_v29 = vrot.slane %v2022_v10, %v3707_v12  ;;  %v2177_v38 = vmul.f32 %v2175_v49, %v3853_v6  ;;  %v2324_v52 = vpop.permute.xlu1 %2323 }
 0x1c2   : > { %v2051_v17 = vrot.slane %v2044_v54, %v3707_v12  ;;  %v4945_v39 = vstv %s4834_s15  ;;  %v4947_v44 = vstv %s4835_s25  ;;  %v4949_v27 = vstv %s4944_s9  ;;  %s4441_s25 = sld [smem:[#allocation11]]  ;;  %s3125_s9 = scalar_lea.vmem %s2583_s28, 192 }
 0x1c3   : > { %v2073_v35 = vrot.slane %v2066_v32, %v3707_v12  ;;  %v2106_v58 = vmul.f32 %v4945_v39, %v2103_v62  ;;  %v4946_v60 = vmov %v4945_v39  ;;  %v2128_v1 = vmul.f32 %v4947_v44, %v2103_v62  ;;  %s4977_s15 = sld [smem:[#allocation64_spill]]  ;;  %p3126_p11 = scmp.ne.s32.totalorder %s2583_s28, %s3125_s9 }
 0x1c4   : > { %v2107_v31 = vmul.f32 %v4946_v60, %v2104_v61  ;;  %v4948_v26 = vmov %v4947_v44  ;;  %v2036_v59 = vrot.slane %v2029_v29, %v3707_v12  ;;  %v2058_v51 = vrot.slane %v2051_v17, %v3707_v12 }
 0x1c5   : > { %v2129_v20 = vmul.f32 %v4948_v26, %v2104_v61  ;;  %v2080_v21 = vrot.slane %v2073_v35, %v3707_v12  ;;  %v2150_v45 = vmul.f32 %v4949_v27, %v2103_v62  ;;  %v4950_v48 = vmov %v4949_v27 }
 0x1c6   : > { %v2110_v14 = vcombine.low %v2106_v58, %v2107_v31  ;;  %v2151_v55 = vmul.f32 %v4950_v48, %v2104_v61  ;;  %v2178_v42 = vmul.f32 %v2176_v28, %v3858_v2  ;;  %v2038_v56 = vadd.f32 %v2036_v59, %v1964_v19  ;;  %v2322_v19 = vpop.permute.xlu0 %2321  ;;  %v2410_v59 = vpop.permute.xlu1 %2409 }
 0x1c7   : > { %v2132_v5 = vcombine.low %v2128_v1, %v2129_v20  ;;  %v2060_v57 = vadd.f32 %v2058_v51, %v1986_v11  ;;  %v2082_v46 = vadd.f32 %v2080_v21, %v2008_v15  ;;  %v4951_v30 = vstv %s4836_s13  ;;  %s4477_s13 = sld [smem:[#allocation11 + $0x4]] }
 0x1c8   : > { %v2180_v41 = vmul.f32 %v4951_v30, %v2177_v38  ;;  %v2117_v50 = vrot.slane %v2110_v14, %v3707_v12  ;;  %v2154_v7 = vcombine.low %v2150_v45, %v2151_v55  ;;  %v4952_v8 = vmov %v4951_v30 }
 0x1c9   : > { %v2139_v22 = vrot.slane %v2132_v5, %v3707_v12  ;;  %v2181_v16 = vmul.f32 %v4952_v8, %v2178_v42  ;;  %v4953_v18 = vstv %s3774_s29  ;;  %v4955_v3 = vstv %s3780_s11  ;;  %s4964_s29 = sld [smem:[#allocation62_spill]] }
 0x1ca   : > { %v2202_v40 = vmul.f32 %v4953_v18, %v2177_v38  ;;  %v4954_v43 = vmov %v4953_v18  ;;  %v2224_v36 = vmul.f32 %v4955_v3, %v2177_v38  ;;  %v4956_v33 = vmov %v4955_v3  ;;  %s4466_s11 = sld [smem:[#allocation12]] }
 0x1cb   : > { %v2203_v23 = vmul.f32 %v4954_v43, %v2178_v42  ;;  %v2225_v25 = vmul.f32 %v4956_v33, %v2178_v42  ;;  %v2124_v11 = vrot.slane %v2117_v50, %v3707_v12  ;;  %v2146_v24 = vrot.slane %v2139_v22, %v3707_v12 }
 0x1cc   : > { %v2161_v37 = vrot.slane %v2154_v7, %v3707_v12  ;;  %v2184_v15 = vcombine.low %v2180_v41, %v2181_v16  ;;  %v2249_v32 = vsel %vm2089_vm6, %v2246_v63, %v2248_v0  ;;  %v2250_v62 = vsel %vm2089_vm6, %v2248_v0, %v2246_v63 }
 0x1cd   : > { %v2206_v10 = vcombine.low %v2202_v40, %v2203_v23  ;;  %v2228_v54 = vcombine.low %v2224_v36, %v2225_v25  ;;  %v2126_v61 = vadd.f32 %v2124_v11, %v2038_v56  ;;  %v2148_v49 = vadd.f32 %v2146_v24, %v2060_v57 }
 0x1ce   : > { %v2168_v28 = vrot.slane %v2161_v37, %v3707_v12  ;;  %v2191_v29 = vrot.slane %v2184_v15, %v3707_v12  ;;  %v2251_v38 = vmul.f32 %v2249_v32, %v3853_v6  ;;  %v2252_v39 = vmul.f32 %v2250_v62, %v3858_v2  ;;  %v2408_v2 = vpop.permute.xlu0 %2407 }
 0x1cf   : > { %v2213_v17 = vrot.slane %v2206_v10, %v3707_v12  ;;  %v2235_v35 = vrot.slane %v2228_v54, %v3707_v12  ;;  %v2326_v63 = vsel %vm2325_vm7, %v2322_v19, %v2324_v52  ;;  %v2327_v60 = vsel %vm2325_vm7, %v2324_v52, %v2322_v19 }
 0x1d0   : > { %v2170_v58 = vadd.f32 %v2168_v28, %v2082_v46  ;;  %v2198_v0 = vrot.slane %v2191_v29, %v3707_v12  ;;  %v4957_v1 = vstv %s3786_s3  ;;  %v4959_v21 = vstv %s3797_s6  ;;  %s4422_s6 = sld [smem:[#allocation15 + $0x2]] }
 0x1d1   : > { %v2220_v31 = vrot.slane %v2213_v17, %v3707_v12  ;;  %v2242_v44 = vrot.slane %v2235_v35, %v3707_v12  ;;  %v2254_v26 = vmul.f32 %v4957_v1, %v2251_v38  ;;  %v4958_v20 = vmov %v4957_v1  ;;  %s4472_s3 = sld [smem:[#allocation11 + $0x3]] }
 0x1d2   : > { %v2255_v6 = vmul.f32 %v4958_v20, %v2252_v39  ;;  %v2200_v51 = vadd.f32 %v2198_v0, %v2126_v61  ;;  %v2276_v27 = vmul.f32 %v4959_v21, %v2251_v38  ;;  %v4960_v45 = vmov %v4959_v21 }
 0x1d3   : > { %v2277_v14 = vmul.f32 %v4960_v45, %v2252_v39  ;;  %v4961_v5 = vstv %s3803_s12  ;;  %v2222_v55 = vadd.f32 %v2220_v31, %v2148_v49  ;;  %v2244_v42 = vadd.f32 %v2242_v44, %v2170_v58  ;;  %s4978_s12 = sld [smem:[#allocation71_spill]] }
 0x1d4   : > { %v2298_v48 = vmul.f32 %v4961_v5, %v2251_v38  ;;  %v2258_v56 = vcombine.low %v2254_v26, %v2255_v6  ;;  %v4962_v57 = vmov %v4961_v5  ;;  %v2339_v41 = vmul.f32 %v3880_v9, %v2326_v63  ;;  %v2484_v6 = vpop.permute.xlu1 %2483 }
 0x1d5   : > { %v2299_v46 = vmul.f32 %v4962_v57, %v2252_v39  ;;  %v2280_v30 = vcombine.low %v2276_v27, %v2277_v14  ;;  %v2340_v50 = vmul.f32 %v3883_v4, %v2327_v60  ;;  %v2411_v22 = vsel %vm2325_vm7, %v2408_v2, %v2410_v59 }
 0x1d6   : > { %v2265_v7 = vrot.slane %v2258_v56, %v3707_v12  ;;  %v2412_v16 = vsel %vm2325_vm7, %v2410_v59, %v2408_v2  ;;  %v2413_v18 = vmul.f32 %v2411_v22, %v3880_v9  ;;  %v4963_v43 = vstv %s3809_s24  ;;  %s4446_s24 = sld [smem:[#allocation11 + $0x1]]  ;;  %v2482_v59 = vpop.permute.xlu0 %2481 }
 0x1d7   : > { %v2302_v8 = vcombine.low %v2298_v48, %v2299_v46  ;;  %v2287_v40 = vrot.slane %v2280_v30, %v3707_v12  ;;  %v2342_v23 = vmul.f32 %v4963_v43, %v2339_v41  ;;  %v4965_v3 = vmov %v4963_v43 }
 0x1d8   : > { %v2343_v36 = vmul.f32 %v4965_v3, %v2340_v50  ;;  %v4966_v33 = vstv %s3819_s27  ;;  %v2272_v52 = vrot.slane %v2265_v7, %v3707_v12  ;;  %v4968_v37 = vstv %s3825_s17  ;;  %s4971_s27 = sld [smem:[#allocation63_spill]] }
 0x1d9   : > { %v2364_v25 = vmul.f32 %v4966_v33, %v2339_v41  ;;  %v2309_v19 = vrot.slane %v2302_v8, %v3707_v12  ;;  %v4967_v11 = vmov %v4966_v33  ;;  %v2386_v15 = vmul.f32 %v4968_v37, %v2339_v41  ;;  %s4460_s17 = sld [smem:[#allocation11 + $0x2]] }
 0x1da   : > { %v2365_v24 = vmul.f32 %v4967_v11, %v2340_v50  ;;  %v2294_v10 = vrot.slane %v2287_v40, %v3707_v12  ;;  %v2346_v54 = vcombine.low %v2342_v23, %v2343_v36  ;;  %v4969_v32 = vmov %v4968_v37 }
 0x1db   : > { %v2387_v62 = vmul.f32 %v4969_v32, %v2340_v50  ;;  %v2414_v61 = vmul.f32 %v2412_v16, %v3883_v4  ;;  %v2274_v49 = vadd.f32 %v2272_v52, %v2200_v51  ;;  %v2316_v28 = vrot.slane %v2309_v19, %v3707_v12 }
 0x1dc   : > { %v2368_v29 = vcombine.low %v2364_v25, %v2365_v24  ;;  %v4970_v17 = vstv %s4964_s29  ;;  %v2296_v38 = vadd.f32 %v2294_v10, %v2222_v55  ;;  %v2353_v39 = vrot.slane %v2346_v54, %v3707_v12 }
 0x1dd   : > { %v2416_v35 = vmul.f32 %v4970_v17, %v2413_v18  ;;  %v2390_v58 = vcombine.low %v2386_v15, %v2387_v62  ;;  %v4972_v0 = vmov %v4970_v17  ;;  %v2318_v60 = vadd.f32 %v2316_v28, %v2244_v42 }
 0x1de   : > { %v2417_v63 = vmul.f32 %v4972_v0, %v2414_v61  ;;  %v2375_v31 = vrot.slane %v2368_v29, %v3707_v12  ;;  %v4973_v44 = vstv %s3841_s23  ;;  %v2360_v2 = vrot.slane %v2353_v39, %v3707_v12  ;;  %s4482_s23 = sld [smem:[#allocation11 + $0x5]] }
 0x1df   : > { %v2438_v1 = vmul.f32 %v4973_v44, %v2413_v18  ;;  %v4974_v26 = vmov %v4973_v44  ;;  %v2397_v51 = vrot.slane %v2390_v58, %v3707_v12  ;;  %v4975_v27 = vstv %s4971_s27 }
 0x1e0   : > { %v2439_v20 = vmul.f32 %v4974_v26, %v2414_v61  ;;  %v2420_v21 = vcombine.low %v2416_v35, %v2417_v63  ;;  %v2460_v45 = vmul.f32 %v4975_v27, %v2413_v18  ;;  %v2382_v14 = vrot.slane %v2375_v31, %v3707_v12 }
 0x1e1   : > { %v4976_v48 = vmov %v4975_v27  ;;  %v2563_v42 = vstv %s4422_s6  ;;  %v2362_v56 = vadd.f32 %v2360_v2, %v2274_v49  ;;  %v2404_v57 = vrot.slane %v2397_v51, %v3707_v12  ;;  %s3228_s6 = smov [#allocation17]  }
 0x1e2   : > { %v2442_v5 = vcombine.low %v2438_v1, %v2439_v20  ;;  %v2461_v55 = vmul.f32 %v4976_v48, %v2414_v61  ;;  %v2427_v46 = vrot.slane %v2420_v21, %v3707_v12  ;;  %v2485_v30 = vsel %vm2325_vm7, %v2482_v59, %v2484_v6  ;;  %s3129_s29 = sshll.u32 %s3228_s6, 4  ;;  %s3130_s29 = int_to_ptr.vmem [resolvable:$false] %s3129_s29 }
 0x1e3   : > { %v2384_v41 = vadd.f32 %v2382_v14, %v2296_v38  ;;  %v2486_v7 = vsel %vm2325_vm7, %v2484_v6, %v2482_v59  ;;  %v2406_v8 = vadd.f32 %v2404_v57, %v2318_v60  ;;  %v2487_v18 = vmul.f32 %v2485_v30, %v3880_v9  ;;  %p3132_p1 = scmp.lt.s32.totalorder %s2583_s28, %s3130_s29 }
 0x1e4   : > { %v2449_v50 = vrot.slane %v2442_v5, %v3707_v12  ;;  %v2464_v22 = vcombine.low %v2460_v45, %v2461_v55  ;;  %v2434_v16 = vrot.slane %v2427_v46, %v3707_v12  ;;  %v2488_v40 = vmul.f32 %v2486_v7, %v3883_v4 }
 0x1e5   : > { %v569_v23 = vstv %s4441_s25  ;;  %v571_v3 = vstv %s4446_s24  ;;  %v4979_v33 = vstv %s3855_s18  ;;  %v4981_v19 = vstv %s4977_s15  ;;  %s4509_s18 = sld [smem:[#allocation11 + $0x8]]  ;;  %s3131_s25 = scalar_lea.vmem %s3130_s29, 384 }
 0x1e6   : > { %v2456_v43 = vrot.slane %v2449_v50, %v3707_v12  ;;  %v2471_v13 = vrot.slane %v2464_v22, %v3707_v12  ;;  %v2436_v36 = vadd.f32 %v2434_v16, %v2362_v56  ;;  %v2490_v25 = vmul.f32 %v4979_v33, %v2487_v18  ;;  %p3133_p6 = scmp.lt.s32.totalorder %s3131_s25, %s3125_s9 }
 0x1e7   : > { %v4980_v52 = vmov %v4979_v33  ;;  %v2512_v4 = vmul.f32 %v4981_v19, %v2487_v18  ;;  %v4982_v37 = vmov %v4981_v19  ;;  %v4983_v10 = vstv %s4978_s12 }
 0x1e8   : > { %v2491_v9 = vmul.f32 %v4980_v52, %v2488_v40  ;;  %v2458_v11 = vadd.f32 %v2456_v43, %v2384_v41  ;;  %v2478_v24 = vrot.slane %v2471_v13, %v3707_v12  ;;  %v2513_v15 = vmul.f32 %v4982_v37, %v2488_v40  ;;  %p3134_p9 = por %p3133_p6, %p3132_p1 }
 0x1e9   : > { %v2534_v54 = vmul.f32 %v4983_v10, %v2487_v18  ;;  %v4985_v62 = vmov %v4983_v10  ;;  %v570_v49 = vmul.f32 %v569_v23, %v3502_v47  ;;  %v572_v28 = vmul.f32 %v571_v3, %v3490_v34 }
 0x1ea   : > { %v2494_v32 = vcombine.low %v2490_v25, %v2491_v9  ;;  %v2535_v61 = vmul.f32 %v4985_v62, %v2488_v40  ;;  %v2480_v29 = vadd.f32 %v2478_v24, %v2406_v8  ;;  %v2516_v17 = vcombine.low %v2512_v4, %v2513_v15 }
 0x1eb   : > { %v574_v35 = vstv %s4460_s17  ;;  %v577_v38 = vstv %s4466_s11  ;;  %v573_v0 = vadd.f32 %v572_v28, %v570_v49  ;;  %v4986_v31 = vlaneseq }
 0x1ec   : > { %v2501_v39 = vrot.slane %v2494_v32, %v3707_v12  ;;  %v2538_v58 = vcombine.low %v2534_v54, %v2535_v61  ;;  %v575_v63 = vmul.f32 %v574_v35, %v3514_v53  ;;  %v2523_v60 = vrot.slane %v2516_v17, %v3707_v12 }
 0x1ed   : > { %vm4518_vm8 = vcmp.lt.s32.totalorder %v4986_v31, 256  ;;  %v585_v1 = vstv %s4472_s3  ;;  %v587_v26 = vstv %s4477_s13  ;;  %v590_v27 = vstv %s4482_s23 }
 0x1ee   : > { %v2508_v20 = vrot.slane %v2501_v39, %v3707_v12  ;;  %v2545_v6 = vrot.slane %v2538_v58, %v3707_v12  ;;  %v576_v59 = vadd.f32 %v575_v63, %v573_v0  ;;  %v586_v2 = vmul.f32 %v585_v1, %v3502_v47 }
 0x1ef   : > { %v2530_v51 = vrot.slane %v2523_v60, %v3707_v12  ;;  %v588_v21 = vmul.f32 %v587_v26, %v3490_v34  ;;  %v593_v45 = vstv %s4486_s7  ;;  %v591_v55 = vmul.f32 %v590_v27, %v3514_v53 }
 0x1f0   : > { %v2510_v14 = vadd.f32 %v2508_v20, %v2436_v36  ;;  %v2552_v5 = vrot.slane %v2545_v6, %v3707_v12  ;;  %v578_v48 = vadd.f32 %v577_v38, %v576_v59  ;;  %v597_v46 = vstv %s4496_s30 }
 0x1f1   : > { %v2532_v56 = vadd.f32 %v2530_v51, %v2458_v11  ;;  %v589_v57 = vadd.f32 %v588_v21, %v586_v2  ;;  %v599_v30 = vstv %s4503_s2  ;;  %v4990_v50 = vstv %s3908_s26  ;;  %s4993_s26 = sld [smem:[#allocation32_spill]] }
 0x1f2   : > { %v2554_v41 = vadd.f32 %v2552_v5, %v2480_v29  ;;  %v2556_v22 = vadd.f32 %v4990_v50, %v2510_v14  ;;  %v579_v7 = vmax.f32 %v578_v48, 0.0  ;;  %v598_v8 = vmul.f32 %v597_v46, %v3502_v47 }
 0x1f3   : > { %v4991_v16 = vstv %s4989_s4  ;;  %v592_v40 = vadd.f32 %v591_v55, %v589_v57  ;;  %v600_v12 = vmul.f32 %v599_v30, %v3490_v34  ;;  %v602_v43 = vstv %s4509_s18 }
 0x1f4   : > { %v2560_v18 = vadd.f32 %v4991_v16, %v2532_v56  ;;  %v2557_v13 = vmax.f32 %v2556_v22, 0.0  ;;  %v2564_v23 = vadd.f32 %v2563_v42, %v2554_v41  ;;  %584 = vst.msk [vmem:[%s411_s5] sm:$0x3] %vm4518_vm8, %v579_v7  ;;  %v603_v3 = vmul.f32 %v602_v43, %v3514_v53 }
 0x1f5   : > { %v594_v33 = vadd.f32 %v593_v45, %v592_v40  ;;  %v601_v47 = vadd.f32 %v600_v12, %v598_v8  ;;  %v605_v52 = vstv %s4526_s16 }
 0x1f6   : > { %v2561_v36 = vmax.f32 %v2560_v18, 0.0  ;;  %v2565_v25 = vmax.f32 %v2564_v23, 0.0  ;;  %2558 = vst.msk [vmem:[%s411_s5 + $0x6] sm:$0x3] %vm4518_vm8, %v2557_v13 }
 0x1f7   : > { %v595_v34 = vmax.f32 %v594_v33, 0.0  ;;  %v604_v9 = vadd.f32 %v603_v3, %v601_v47  ;;  %p4995_p10 = scmp.ne.s32.totalorder %s4993_s26, 0 }
 0x1f8   : > { %2562 = vst.msk [vmem:[%s411_s5 + $0x8] sm:$0x3] %vm4518_vm8, %v2561_v36  ;;  %2566 = vst.msk [vmem:[%s411_s5 + $0xa] sm:$0x3] %vm4518_vm8, %v2565_v25 }
 0x1f9   : > { %596 = vst.msk [vmem:[%s411_s5 + $0x2] sm:$0x3] %vm4518_vm8, %v595_v34  ;;  %v606_v53 = vadd.f32 %v605_v52, %v604_v9  ;;  %p3127_p12 = pnand %p3126_p11, %p4995_p10 }
 0x1fb   : > { %v607_v42 = vmax.f32 %v606_v53, 0.0  ;;  %p3128_p8 = pneg %p3127_p12 }
 0x1fd   : > { %608 = vst.msk [vmem:[%s411_s5 + $0x4] sm:$0x3] %vm4518_vm8, %v607_v42  ;;  %p3135_p3 = pnand %p3134_p9, %p3128_p8 }
 0x1ff   : > { %3138 = shalt.err (!%p3135_p3)
}
 0x200   : > { %s3139_s27 = scalar_lea.hbm %s2580_s0, 192  ;;  %s3143_s11 = scalar_lea.hbm %s4994_s1, 384 }
 0x201   : > { %p3140_p13 = scmp.ne.s32.totalorder %s2580_s0, %s3139_s27  ;;  %p3144_p5 = scmp.lt.s32.totalorder %s2580_s0, %s4994_s1 }
 0x202   : > { %p3145_p4 = scmp.lt.s32.totalorder %s3143_s11, %s3139_s27 }
 0x203   : > { %p3141_p0 = pnand %p3140_p13, %p4995_p10 }
 0x204   : > { %p3146_p7 = por %p3145_p4, %p3144_p5 }
 0x205   : > { %p3142_p2 = pneg %p3141_p0 }
 0x207   : > { %p3147_p11 = pnand %p3146_p7, %p3142_p2 }
 0x209   : > { %3150 = shalt.err (!%p3147_p11)
}
 0x20a   : > { %2885 = dma.vmem_to_hbm [thread:$0]  (%p4995_p10), %s2583_s28, 192, %s2580_s0, %s2568_s14  }
 0x20b PF: > { %s4996_s13 = sld [smem:[#allocation25_spill]] }
 0x20c   : > { %s4997_s12 = sld [smem:[#allocation33_spill]] }
 0x20d   : > { %s4998_s23 = sld [smem:[#allocation28_spill]] }
 0x211   : > { %s2594_s7 = sand.u32 1, %s4996_s13  }
 0x212   : > { %p4999_p12 = scmp.ne.s32.totalorder %s4997_s12, 0  ;;  %s2595_s30 = scalar_lea.sflag [#allocation4], %s2594_s7 }
 0x213   : > { %p5000_p8 = scmp.ge.s32.totalorder %s4998_s23, 2 }
 0x215   : > { %p2914_p1 = pnand %p5000_p8, %p4999_p12 }
 0x217   : > { %p2915_p6 = pneg %p2914_p1 }
 0x219   : > { %3192 = dma.done.wait (%p2915_p6), %s2595_s30, 192  }
 0x21a   : > { %3194 = vsyncadd (%p2915_p6), %s2595_s30, 4294967104  ;;  %s5001_s30 = sld [smem:[#allocation30_spill]] }
 0x21b   : > { %s5002_s27 = sld [smem:[#allocation26_spill]] }
 0x21c   : > { %s5003_s28 = sld [smem:[#allocation27_spill]] }
 0x21d   : > { %s5004_s29 = sld [smem:[#allocation31_spill]] }
 0x220   : > { %p26_p9 = scmp.ge.s32.totalorder %s5001_s30, 4  }
 0x222   :  { %28 = sbr.rel (!%p26_p9) target bundleno = 20 (0x14), region = 133 }
 0x227   :  { %2600 = vsyncpa [#allocation3], 1 }
 0x228   :  { %2602 = vsyncpa [#allocation3 + $0x1], 1 }
 0x229   :  { %2603 = vsyncpa [#allocation7], 1 }
 0x22a   :  { %2604 = vsyncpa [#allocation4], 1 }
 0x22b   :  { %2606 = vsyncpa [#allocation4 + $0x1], 1 }
 0x22c   :  { %2607 = vsyncpa [#allocation5], 1 }
 0x22d   :  { %2609 = vsyncpa [#allocation5 + $0x1], 1 }
 0x22e   :  { %2610 = vsyncpa [#allocation10], 1 }
 0x22f   :  { %2611 = vsyncpa [#allocation13], 1 }
 0x230   :  { %2612 = vsyncpa [#allocation16], 1 }

</bundles_post_ra>
